<compile_context>
chip_gen: v7x
topology: tpu7x:2x2x1
jax: 0.10.0
libtpu: 0.0.40
codegen_flags: <defaults>
</compile_context>

<pallas_src>
from functools import partial

import jax
import jax.numpy as jnp
from jax import lax
from jax.experimental import pallas as pl
from jax.experimental.pallas import tpu as pltpu


def _round_up(x, m):
    return (x + m - 1) // m * m


def _pick_batch_tile(B):
    """Batch tile size: large tiles amortize ~0.35us/step pipeline overhead,
    but keep >= 2 grid steps at moderate batch so v7x dual-TC gets work."""
    if B >= 1024:
        return 512
    if B >= 512:
        return 256
    return max(16, _round_up(B, 16))      # single grid step, bf16-sublane aligned


def ncf_kernel(apply_sigmoid,             # static python bool (style == 'implicit')
               ug_ref, ig_ref, um_ref, im_ref,
               w1u_ref, w1i_ref, b1_ref,
               w2_ref, b2_ref, w3_ref, b3_ref, w4_ref, b4_ref,
               wp_gmf_ref, wp_mlp_ref, bp_ref,
               out_ref):
    f32 = jnp.float32
    bf16 = jnp.bfloat16

    # ---- GMF branch: elementwise product of GMF embeddings (VPU, f32) -----
    gmf = ug_ref[...].astype(f32) * ig_ref[...].astype(f32)          # (TB, F)

    # ---- MLP branch --------------------------------------------------------
    # interaction = concat([um, im], -1); concat-free because w1 was split
    # along its input rows in the wrapper:  [um, im] @ W1 == um@W1u + im@W1i.
    h = (jnp.dot(um_ref[...], w1u_ref[...], preferred_element_type=f32)
         + jnp.dot(im_ref[...], w1i_ref[...], preferred_element_type=f32)
         + b1_ref[...])
    h = jnp.maximum(h, 0.0)
    for w_ref, b_ref in ((w2_ref, b2_ref), (w3_ref, b3_ref), (w4_ref, b4_ref)):
        h = jnp.dot(h.astype(bf16), w_ref[...],
                    preferred_element_type=f32) + b_ref[...]
        h = jnp.maximum(h, 0.0)                                       # (TB, F)

    # ---- predict layer on concat([gmf, h], -1), concat- and transpose-free -
    # Contract the last dim of wp against the last dim of gmf/h (native MXU
    # trans_b path) -> lane-dense (1, TB) result; bf16 operands, f32 acc.
    dn = (((1,), (1,)), ((), ()))
    pred = (lax.dot_general(wp_gmf_ref[...].astype(bf16), gmf.astype(bf16),
                            dn, preferred_element_type=f32)
            + lax.dot_general(wp_mlp_ref[...].astype(bf16), h.astype(bf16),
                              dn, preferred_element_type=f32)
            + bp_ref[0, 0])                                           # (1, TB)
    if apply_sigmoid:
        pred = jax.nn.sigmoid(pred)
    out_ref[...] = pred


def ncf_forward(params, user, item, style='explicit'):
    B = int(user.shape[0])
    TB = _pick_batch_tile(B)
    B_pad = _round_up(B, TB)
    if B_pad != B:
        user = jnp.pad(user, (0, B_pad - B))
        item = jnp.pad(item, (0, B_pad - B))

    # Embedding gathers (plain-JAX glue; tables are bf16 -> halved HBM trip).
    ug = params['embed_user_GMF'][user]
    ig = params['embed_item_GMF'][item]
    um = params['embed_user_MLP'][user]
    im = params['embed_item_MLP'][item]

    F = ug.shape[-1]          # factor_num
    D = um.shape[-1]          # MLP embedding dim

    # Pre-split w1 along its input rows (matches concat([um, im]) ordering);
    # avoids any in-kernel Ref slicing on the hottest matmul operand.
    w1 = params['w1']
    w1_um, w1_im = w1[:D, :], w1[D:, :]

    args = [ug, ig, um, im,
            w1_um, w1_im, params['b1'],
            params['w2'], params['b2'],
            params['w3'], params['b3'],
            params['w4'], params['b4'],
            params['wp_gmf'], params['wp_mlp'], params['bp']]

    def tile_spec(feat):      # per-batch-tile activation blocks (pipelined)
        return pl.BlockSpec((TB, feat), lambda i: (i, 0))

    def resident_spec(arr):   # weights/biases: constant index -> DMA'd once
        return pl.BlockSpec(arr.shape, lambda i: (0, 0))

    in_specs = [
        tile_spec(F), tile_spec(F), tile_spec(D), tile_spec(D),
        resident_spec(w1_um), resident_spec(w1_im), resident_spec(params['b1']),
        resident_spec(params['w2']), resident_spec(params['b2']),
        resident_spec(params['w3']), resident_spec(params['b3']),
        resident_spec(params['w4']), resident_spec(params['b4']),
        resident_spec(params['wp_gmf']), resident_spec(params['wp_mlp']),
        pl.BlockSpec(memory_space=pltpu.MemorySpace.SMEM),   # bp scalar
    ]
    out_specs = pl.BlockSpec((1, TB), lambda i: (0, i))      # lane-dense row

    # Cost hint: weights are read once, activations once per row (the arrays
    # passed already carry their true per-row / once sizes), output per row.
    matmul_flops = 2 * B_pad * sum(
        params[n].shape[0] * params[n].shape[1] for n in ('w1', 'w2', 'w3', 'w4'))
    predict_flops = 2 * B_pad * 2 * F + B_pad * F
    cost = pl.CostEstimate(
        flops=matmul_flops + predict_flops,
        transcendentals=B_pad if style == 'implicit' else 0,
        bytes_accessed=sum(int(a.size) * a.dtype.itemsize for a in args)
                       + B_pad * 4)

    pred = pl.pallas_call(
        partial(ncf_kernel, style == 'implicit'),
        out_shape=jax.ShapeDtypeStruct((1, B_pad), jnp.float32),
        grid=(B_pad // TB,),
        in_specs=in_specs,
        out_specs=out_specs,
        compiler_params=pltpu.CompilerParams(
            dimension_semantics=("parallel",),
            vmem_limit_bytes=32 * 1024 * 1024),
        cost_estimate=cost,
    )(*args)
    # .view(-1) in the torch module; drop padded rows.
    return pred.reshape(-1)[:B]


def ncf_reference(params, user, item, style='explicit'):
    """Pure-JAX reference mirroring the kernel's precision policy
    (bf16 matmul operands, f32 accumulation)."""
    f32, bf16 = jnp.float32, jnp.bfloat16
    ug = params['embed_user_GMF'][user].astype(f32)
    ig = params['embed_item_GMF'][item].astype(f32)
    um = params['embed_user_MLP'][user]
    im = params['embed_item_MLP'][item]
    gmf = ug * ig
    x = jnp.concatenate([um, im], axis=-1)
    for i in range(1, 5):
        w, b = params[f'w{i}'], params[f'b{i}']
        x = jnp.dot(x.astype(bf16), w, preferred_element_type=f32) + b
        x = jnp.maximum(x, 0.0)
    pred = (jnp.dot(gmf.astype(bf16), params['wp_gmf'][0].astype(bf16),
                    preferred_element_type=f32)
            + jnp.dot(x.astype(bf16), params['wp_mlp'][0].astype(bf16),
                      preferred_element_type=f32)
            + params['bp'][0, 0])
    if style == 'implicit':
        pred = jax.nn.sigmoid(pred)
    return pred


def init_params(key, user_num, item_num, factor_num=64, num_layers=4):
    keys = jax.random.split(key, 16)
    mlp_dim = factor_num * 2 ** (num_layers - 1)
    bf16 = jnp.bfloat16
    p = {}
    p['embed_user_GMF'] = (0.01 * jax.random.normal(
        keys[0], (user_num, factor_num), jnp.float32)).astype(bf16)
    p['embed_item_GMF'] = (0.01 * jax.random.normal(
        keys[1], (item_num, factor_num), jnp.float32)).astype(bf16)
    p['embed_user_MLP'] = (0.01 * jax.random.normal(
        keys[2], (user_num, mlp_dim), jnp.float32)).astype(bf16)
    p['embed_item_MLP'] = (0.01 * jax.random.normal(
        keys[3], (item_num, mlp_dim), jnp.float32)).astype(bf16)

    # MLP: num_layers Linear layers, input_size = factor_num * 2**(num_layers - i)
    for i in range(num_layers):
        in_size = factor_num * 2 ** (num_layers - i)
        out_size = in_size // 2
        bound = (6.0 / (in_size + out_size)) ** 0.5  # xavier_uniform
        p[f'w{i + 1}'] = jax.random.uniform(
            keys[4 + i], (in_size, out_size), jnp.float32, -bound, bound).astype(bf16)
        p[f'b{i + 1}'] = jnp.zeros((1, out_size), jnp.float32)

    # predict layer: (2 * factor_num) -> 1, stored split into GMF / MLP halves
    predict_size = factor_num * 2
    bound = (3.0 / predict_size) ** 0.5
    wp = jax.random.uniform(keys[10], (1, predict_size), jnp.float32, -bound, bound)
    p['wp_gmf'] = wp[:, :factor_num]
    p['wp_mlp'] = wp[:, factor_num:]
    p['bp'] = jnp.zeros((1, 1), jnp.float32)
    return p


if __name__ == "__main__":
    key = jax.random.PRNGKey(0)
    k_param, k_user, k_item = jax.random.split(key, 3)

    user_num, item_num = 32, 48
    factor_num, num_layers = 64, 4
    batch = 8

    params = init_params(k_param, user_num, item_num, factor_num, num_layers)
    user = jax.random.randint(k_user, (batch,), 0, user_num, dtype=jnp.int32)
    item = jax.random.randint(k_item, (batch,), 0, item_num, dtype=jnp.int32)

    for style in ('explicit', 'implicit'):
        out = jax.block_until_ready(ncf_forward(params, user, item, style=style))
        ref = ncf_reference(params, user, item, style=style)
        assert out.shape == (batch,), out.shape
        assert jnp.allclose(out, ref, rtol=5e-3, atol=5e-5), (style, out, ref)

    print("KERNEL_OK")
</pallas_src>

<mosaic_0001>
module attributes {stable_mosaic.version = 11 : i64} {
  func.func @ncf_kernel(%arg0: i32, %arg1: memref<16x64xbf16, #tpu.memory_space<vmem>>, %arg2: memref<16x64xbf16, #tpu.memory_space<vmem>>, %arg3: memref<16x512xbf16, #tpu.memory_space<vmem>>, %arg4: memref<16x512xbf16, #tpu.memory_space<vmem>>, %arg5: memref<512x512xbf16, #tpu.memory_space<vmem>>, %arg6: memref<512x512xbf16, #tpu.memory_space<vmem>>, %arg7: memref<1x512xf32, #tpu.memory_space<vmem>>, %arg8: memref<512x256xbf16, #tpu.memory_space<vmem>>, %arg9: memref<1x256xf32, #tpu.memory_space<vmem>>, %arg10: memref<256x128xbf16, #tpu.memory_space<vmem>>, %arg11: memref<1x128xf32, #tpu.memory_space<vmem>>, %arg12: memref<128x64xbf16, #tpu.memory_space<vmem>>, %arg13: memref<1x64xf32, #tpu.memory_space<vmem>>, %arg14: memref<1x64xf32, #tpu.memory_space<vmem>>, %arg15: memref<1x64xf32, #tpu.memory_space<vmem>>, %arg16: memref<1x1xf32, #tpu.memory_space<smem>>, %arg17: memref<1x16xf32, #tpu.memory_space<vmem>>) attributes {dimension_semantics = [#tpu.dimension_semantics<parallel>], iteration_bounds = array<i64: 1>, scalar_prefetch = 0 : i64, scratch_operands = 0 : i64, tpu.core_type = #tpu.core_type<tc>, window_params = [{transform_indices = @transform_0, window_bounds = array<i64: 16, 64>}, {transform_indices = @transform_1, window_bounds = array<i64: 16, 64>}, {transform_indices = @transform_2, window_bounds = array<i64: 16, 512>}, {transform_indices = @transform_3, window_bounds = array<i64: 16, 512>}, {pipeline_mode = #tpu.pipeline_mode<synchronous>, transform_indices = @transform_4, window_bounds = array<i64: 512, 512>}, {pipeline_mode = #tpu.pipeline_mode<synchronous>, transform_indices = @transform_5, window_bounds = array<i64: 512, 512>}, {pipeline_mode = #tpu.pipeline_mode<synchronous>, transform_indices = @transform_6, window_bounds = array<i64: 1, 512>}, {pipeline_mode = #tpu.pipeline_mode<synchronous>, transform_indices = @transform_7, window_bounds = array<i64: 512, 256>}, {pipeline_mode = #tpu.pipeline_mode<synchronous>, transform_indices = @transform_8, window_bounds = array<i64: 1, 256>}, {pipeline_mode = #tpu.pipeline_mode<synchronous>, transform_indices = @transform_9, window_bounds = array<i64: 256, 128>}, {pipeline_mode = #tpu.pipeline_mode<synchronous>, transform_indices = @transform_10, window_bounds = array<i64: 1, 128>}, {pipeline_mode = #tpu.pipeline_mode<synchronous>, transform_indices = @transform_11, window_bounds = array<i64: 128, 64>}, {pipeline_mode = #tpu.pipeline_mode<synchronous>, transform_indices = @transform_12, window_bounds = array<i64: 1, 64>}, {pipeline_mode = #tpu.pipeline_mode<synchronous>, transform_indices = @transform_13, window_bounds = array<i64: 1, 64>}, {pipeline_mode = #tpu.pipeline_mode<synchronous>, transform_indices = @transform_14, window_bounds = array<i64: 1, 64>}, {transform_indices = @transform_15, window_bounds = array<i64: 1, 1>}, {transform_indices = @transform_16, window_bounds = array<i64: 1, 16>}]} {
    %c0 = arith.constant 0 : index
    %c0_0 = arith.constant 0 : index
    %0 = vector.load %arg1[%c0, %c0_0] : memref<16x64xbf16, #tpu.memory_space<vmem>>, vector<16x64xbf16>
    %1 = arith.extf %0 : vector<16x64xbf16> to vector<16x64xf32>
    %c0_1 = arith.constant 0 : index
    %c0_2 = arith.constant 0 : index
    %2 = vector.load %arg2[%c0_1, %c0_2] : memref<16x64xbf16, #tpu.memory_space<vmem>>, vector<16x64xbf16>
    %3 = arith.extf %2 : vector<16x64xbf16> to vector<16x64xf32>
    %4 = arith.mulf %1, %3 : vector<16x64xf32>
    %c0_3 = arith.constant 0 : index
    %c0_4 = arith.constant 0 : index
    %5 = vector.load %arg3[%c0_3, %c0_4] : memref<16x512xbf16, #tpu.memory_space<vmem>>, vector<16x512xbf16>
    %c0_5 = arith.constant 0 : index
    %c0_6 = arith.constant 0 : index
    %6 = vector.load %arg5[%c0_5, %c0_6] : memref<512x512xbf16, #tpu.memory_space<vmem>>, vector<512x512xbf16>
    %cst = arith.constant dense<0.000000e+00> : vector<16x512xf32>
    %7 = tpu.matmul %5, %6, %cst {dimension_numbers = #tpu.dot_dimension_numbers<[1], [0], [0], [1], [0, 0, 1, 1], [], []>} : vector<16x512xbf16>, vector<512x512xbf16>, vector<16x512xf32> -> vector<16x512xf32>
    %c0_7 = arith.constant 0 : index
    %c0_8 = arith.constant 0 : index
    %8 = vector.load %arg4[%c0_7, %c0_8] : memref<16x512xbf16, #tpu.memory_space<vmem>>, vector<16x512xbf16>
    %c0_9 = arith.constant 0 : index
    %c0_10 = arith.constant 0 : index
    %9 = vector.load %arg6[%c0_9, %c0_10] : memref<512x512xbf16, #tpu.memory_space<vmem>>, vector<512x512xbf16>
    %cst_11 = arith.constant dense<0.000000e+00> : vector<16x512xf32>
    %10 = tpu.matmul %8, %9, %cst_11 {dimension_numbers = #tpu.dot_dimension_numbers<[1], [0], [0], [1], [0, 0, 1, 1], [], []>} : vector<16x512xbf16>, vector<512x512xbf16>, vector<16x512xf32> -> vector<16x512xf32>
    %11 = arith.addf %7, %10 : vector<16x512xf32>
    %c0_12 = arith.constant 0 : index
    %c0_13 = arith.constant 0 : index
    %12 = vector.load %arg7[%c0_12, %c0_13] : memref<1x512xf32, #tpu.memory_space<vmem>>, vector<1x512xf32>
    %13 = vector.broadcast %12 : vector<1x512xf32> to vector<16x512xf32>
    %14 = arith.addf %11, %13 : vector<16x512xf32>
    %cst_14 = arith.constant 0.000000e+00 : f32
    %15 = vector.broadcast %cst_14 : f32 to vector<16x512xf32>
    %16 = arith.maximumf %14, %15 : vector<16x512xf32>
    %17 = arith.truncf %16 : vector<16x512xf32> to vector<16x512xbf16>
    %c0_15 = arith.constant 0 : index
    %c0_16 = arith.constant 0 : index
    %18 = vector.load %arg8[%c0_15, %c0_16] : memref<512x256xbf16, #tpu.memory_space<vmem>>, vector<512x256xbf16>
    %cst_17 = arith.constant dense<0.000000e+00> : vector<16x256xf32>
    %19 = tpu.matmul %17, %18, %cst_17 {dimension_numbers = #tpu.dot_dimension_numbers<[1], [0], [0], [1], [0, 0, 1, 1], [], []>} : vector<16x512xbf16>, vector<512x256xbf16>, vector<16x256xf32> -> vector<16x256xf32>
    %c0_18 = arith.constant 0 : index
    %c0_19 = arith.constant 0 : index
    %20 = vector.load %arg9[%c0_18, %c0_19] : memref<1x256xf32, #tpu.memory_space<vmem>>, vector<1x256xf32>
    %21 = vector.broadcast %20 : vector<1x256xf32> to vector<16x256xf32>
    %22 = arith.addf %19, %21 : vector<16x256xf32>
    %cst_20 = arith.constant 0.000000e+00 : f32
    %23 = vector.broadcast %cst_20 : f32 to vector<16x256xf32>
    %24 = arith.maximumf %22, %23 : vector<16x256xf32>
    %25 = arith.truncf %24 : vector<16x256xf32> to vector<16x256xbf16>
    %c0_21 = arith.constant 0 : index
    %c0_22 = arith.constant 0 : index
    %26 = vector.load %arg10[%c0_21, %c0_22] : memref<256x128xbf16, #tpu.memory_space<vmem>>, vector<256x128xbf16>
    %cst_23 = arith.constant dense<0.000000e+00> : vector<16x128xf32>
    %27 = tpu.matmul %25, %26, %cst_23 {dimension_numbers = #tpu.dot_dimension_numbers<[1], [0], [0], [1], [0, 0, 1, 1], [], []>} : vector<16x256xbf16>, vector<256x128xbf16>, vector<16x128xf32> -> vector<16x128xf32>
    %c0_24 = arith.constant 0 : index
    %c0_25 = arith.constant 0 : index
    %28 = vector.load %arg11[%c0_24, %c0_25] : memref<1x128xf32, #tpu.memory_space<vmem>>, vector<1x128xf32>
    %29 = vector.broadcast %28 : vector<1x128xf32> to vector<16x128xf32>
    %30 = arith.addf %27, %29 : vector<16x128xf32>
    %cst_26 = arith.constant 0.000000e+00 : f32
    %31 = vector.broadcast %cst_26 : f32 to vector<16x128xf32>
    %32 = arith.maximumf %30, %31 : vector<16x128xf32>
    %33 = arith.truncf %32 : vector<16x128xf32> to vector<16x128xbf16>
    %c0_27 = arith.constant 0 : index
    %c0_28 = arith.constant 0 : index
    %34 = vector.load %arg12[%c0_27, %c0_28] : memref<128x64xbf16, #tpu.memory_space<vmem>>, vector<128x64xbf16>
    %cst_29 = arith.constant dense<0.000000e+00> : vector<16x64xf32>
    %35 = tpu.matmul %33, %34, %cst_29 {dimension_numbers = #tpu.dot_dimension_numbers<[1], [0], [0], [1], [0, 0, 1, 1], [], []>} : vector<16x128xbf16>, vector<128x64xbf16>, vector<16x64xf32> -> vector<16x64xf32>
    %c0_30 = arith.constant 0 : index
    %c0_31 = arith.constant 0 : index
    %36 = vector.load %arg13[%c0_30, %c0_31] : memref<1x64xf32, #tpu.memory_space<vmem>>, vector<1x64xf32>
    %37 = vector.broadcast %36 : vector<1x64xf32> to vector<16x64xf32>
    %38 = arith.addf %35, %37 : vector<16x64xf32>
    %cst_32 = arith.constant 0.000000e+00 : f32
    %39 = vector.broadcast %cst_32 : f32 to vector<16x64xf32>
    %40 = arith.maximumf %38, %39 : vector<16x64xf32>
    %c0_33 = arith.constant 0 : index
    %c0_34 = arith.constant 0 : index
    %41 = vector.load %arg14[%c0_33, %c0_34] : memref<1x64xf32, #tpu.memory_space<vmem>>, vector<1x64xf32>
    %42 = arith.truncf %41 : vector<1x64xf32> to vector<1x64xbf16>
    %43 = arith.truncf %4 : vector<16x64xf32> to vector<16x64xbf16>
    %cst_35 = arith.constant dense<0.000000e+00> : vector<1x16xf32>
    %44 = tpu.matmul %42, %43, %cst_35 {dimension_numbers = #tpu.dot_dimension_numbers<[1], [1], [0], [0], [0, 0, 1, 0], [], []>} : vector<1x64xbf16>, vector<16x64xbf16>, vector<1x16xf32> -> vector<1x16xf32>
    %c0_36 = arith.constant 0 : index
    %c0_37 = arith.constant 0 : index
    %45 = vector.load %arg15[%c0_36, %c0_37] : memref<1x64xf32, #tpu.memory_space<vmem>>, vector<1x64xf32>
    %46 = arith.truncf %45 : vector<1x64xf32> to vector<1x64xbf16>
    %47 = arith.truncf %40 : vector<16x64xf32> to vector<16x64xbf16>
    %cst_38 = arith.constant dense<0.000000e+00> : vector<1x16xf32>
    %48 = tpu.matmul %46, %47, %cst_38 {dimension_numbers = #tpu.dot_dimension_numbers<[1], [1], [0], [0], [0, 0, 1, 0], [], []>} : vector<1x64xbf16>, vector<16x64xbf16>, vector<1x16xf32> -> vector<1x16xf32>
    %49 = arith.addf %44, %48 : vector<1x16xf32>
    %c0_39 = arith.constant 0 : index
    %c0_40 = arith.constant 0 : index
    %50 = memref.load %arg16[%c0_39, %c0_40] : memref<1x1xf32, #tpu.memory_space<smem>>
    %51 = vector.broadcast %50 : f32 to vector<1x16xf32>
    %52 = arith.addf %49, %51 : vector<1x16xf32>
    %c0_41 = arith.constant 0 : index
    %c0_42 = arith.constant 0 : index
    %53 = vector.load %arg17[%c0_41, %c0_42] : memref<1x16xf32, #tpu.memory_space<vmem>>, vector<1x16xf32>
    tpu.vector_store %arg17[%c0_41, %c0_42], %52 {strides = array<i32>} : memref<1x16xf32, #tpu.memory_space<vmem>>, vector<1x16xf32>,
    return
  }
  func.func @transform_0(%arg0: i32) -> (i32, i32) {
    %c0_i32 = arith.constant 0 : i32
    %c0_i32_0 = arith.constant 0 : i32
    return %arg0, %c0_i32 : i32, i32
  }
  func.func @transform_1(%arg0: i32) -> (i32, i32) {
    %c0_i32 = arith.constant 0 : i32
    %c0_i32_0 = arith.constant 0 : i32
    return %arg0, %c0_i32 : i32, i32
  }
  func.func @transform_2(%arg0: i32) -> (i32, i32) {
    %c0_i32 = arith.constant 0 : i32
    %c0_i32_0 = arith.constant 0 : i32
    return %arg0, %c0_i32 : i32, i32
  }
  func.func @transform_3(%arg0: i32) -> (i32, i32) {
    %c0_i32 = arith.constant 0 : i32
    %c0_i32_0 = arith.constant 0 : i32
    return %arg0, %c0_i32 : i32, i32
  }
  func.func @transform_4(%arg0: i32) -> (i32, i32) {
    %c0_i32 = arith.constant 0 : i32
    %c0_i32_0 = arith.constant 0 : i32
    %c0_i32_1 = arith.constant 0 : i32
    return %c0_i32, %c0_i32_0 : i32, i32
  }
  func.func @transform_5(%arg0: i32) -> (i32, i32) {
    %c0_i32 = arith.constant 0 : i32
    %c0_i32_0 = arith.constant 0 : i32
    %c0_i32_1 = arith.constant 0 : i32
    return %c0_i32, %c0_i32_0 : i32, i32
  }
  func.func @transform_6(%arg0: i32) -> (i32, i32) {
    %c0_i32 = arith.constant 0 : i32
    %c0_i32_0 = arith.constant 0 : i32
    %c0_i32_1 = arith.constant 0 : i32
    return %c0_i32, %c0_i32_0 : i32, i32
  }
  func.func @transform_7(%arg0: i32) -> (i32, i32) {
    %c0_i32 = arith.constant 0 : i32
    %c0_i32_0 = arith.constant 0 : i32
    %c0_i32_1 = arith.constant 0 : i32
    return %c0_i32, %c0_i32_0 : i32, i32
  }
  func.func @transform_8(%arg0: i32) -> (i32, i32) {
    %c0_i32 = arith.constant 0 : i32
    %c0_i32_0 = arith.constant 0 : i32
    %c0_i32_1 = arith.constant 0 : i32
    return %c0_i32, %c0_i32_0 : i32, i32
  }
  func.func @transform_9(%arg0: i32) -> (i32, i32) {
    %c0_i32 = arith.constant 0 : i32
    %c0_i32_0 = arith.constant 0 : i32
    %c0_i32_1 = arith.constant 0 : i32
    return %c0_i32, %c0_i32_0 : i32, i32
  }
  func.func @transform_10(%arg0: i32) -> (i32, i32) {
    %c0_i32 = arith.constant 0 : i32
    %c0_i32_0 = arith.constant 0 : i32
    %c0_i32_1 = arith.constant 0 : i32
    return %c0_i32, %c0_i32_0 : i32, i32
  }
  func.func @transform_11(%arg0: i32) -> (i32, i32) {
    %c0_i32 = arith.constant 0 : i32
    %c0_i32_0 = arith.constant 0 : i32
    %c0_i32_1 = arith.constant 0 : i32
    return %c0_i32, %c0_i32_0 : i32, i32
  }
  func.func @transform_12(%arg0: i32) -> (i32, i32) {
    %c0_i32 = arith.constant 0 : i32
    %c0_i32_0 = arith.constant 0 : i32
    %c0_i32_1 = arith.constant 0 : i32
    return %c0_i32, %c0_i32_0 : i32, i32
  }
  func.func @transform_13(%arg0: i32) -> (i32, i32) {
    %c0_i32 = arith.constant 0 : i32
    %c0_i32_0 = arith.constant 0 : i32
    %c0_i32_1 = arith.constant 0 : i32
    return %c0_i32, %c0_i32_0 : i32, i32
  }
  func.func @transform_14(%arg0: i32) -> (i32, i32) {
    %c0_i32 = arith.constant 0 : i32
    %c0_i32_0 = arith.constant 0 : i32
    %c0_i32_1 = arith.constant 0 : i32
    return %c0_i32, %c0_i32_0 : i32, i32
  }
  func.func @transform_15(%arg0: i32) -> (i32, i32) {
    %c0_i32 = arith.constant 0 : i32
    %c0_i32_0 = arith.constant 0 : i32
    %c0_i32_1 = arith.constant 0 : i32
    return %c0_i32, %c0_i32_0 : i32, i32
  }
  func.func @transform_16(%arg0: i32) -> (i32, i32) {
    %c0_i32 = arith.constant 0 : i32
    %c0_i32_0 = arith.constant 0 : i32
    return %c0_i32, %arg0 : i32, i32
  }
}

</mosaic_0001>

<bundles_post_ra>
// kernel: tpu_custom_call.1
= control target key start
LH: loop header
LB: loop body
LE: loop exit
PB: predicated region body
PF: predicated region fallthrough
CT: control target
= control target key end

     0   :  { %s4608_s0 = inlined_call_operand.hbm [shape: bf16[16,64], index: 0, kind: input, shape index: {}]   ;;  %s4609_s1 = inlined_call_operand.hbm [shape: bf16[16,64], index: 1, kind: input, shape index: {}]   ;;  %s4610_s2 = inlined_call_operand.hbm [shape: bf16[16,512], index: 2, kind: input, shape index: {}]   ;;  %s4611_s3 = inlined_call_operand.hbm [shape: bf16[16,512], index: 3, kind: input, shape index: {}]   ;;  %s4612_s4 = inlined_call_operand.hbm [shape: bf16[512,512], index: 4, kind: input, shape index: {}]   ;;  %s4613_s5 = inlined_call_operand.hbm [shape: bf16[512,512], index: 5, kind: input, shape index: {}]   ;;  %s4614_s6 = inlined_call_operand.vmem [shape: f32[1,512], index: 6, kind: input, shape index: {}]   ;;  %s4615_s7 = inlined_call_operand.hbm [shape: bf16[512,256], index: 7, kind: input, shape index: {}]   ;;  %s4616_s8 = inlined_call_operand.hbm [shape: f32[1,256], index: 8, kind: input, shape index: {}]   ;;  %s4617_s9 = inlined_call_operand.vmem [shape: bf16[256,128], index: 9, kind: input, shape index: {}]   ;;  %s4618_s10 = inlined_call_operand.vmem [shape: f32[1,128], index: 10, kind: input, shape index: {}]   ;;  %s4619_s11 = inlined_call_operand.vmem [shape: bf16[128,64], index: 11, kind: input, shape index: {}]   ;;  %s4620_s12 = inlined_call_operand.vmem [shape: f32[1,64], index: 12, kind: input, shape index: {}]   ;;  %s4621_s13 = inlined_call_operand.vmem [shape: f32[1,64], index: 13, kind: input, shape index: {}]   ;;  %s4622_s14 = inlined_call_operand.vmem [shape: f32[1,64], index: 14, kind: input, shape index: {}]   ;;  %s4623_s15 = inlined_call_operand.<no memory space> [shape: f32[1,1], index: 15, kind: input, shape index: {}]   ;;  %s4624_s16 = inlined_call_operand.hbm [shape: f32[1,16], index: 16, kind: output, shape index: {}]  }
   0x1   :  { %4628 = sst [smem:[#allocation24_spill]] %s4608_s0 }
   0x2   :  { %4629 = sst [smem:[#allocation25_spill]] %s4624_s16 }
   0x3   :  { %22 = vsyncpa [#allocation4], 0 }
   0x4   :  { %23 = vsyncpa [#allocation7], 0 }
   0x5   :  { %24 = vsyncpa [#allocation10], 0 }
   0x6   :  { %25 = vsyncpa [#allocation13], 0 }
   0x7   :  { %26 = vsyncpa [#allocation16], 0 }
   0x8   :  { %27 = vsyncpa [#allocation5], 0  ;;  %s4253_s21 = smov [#allocation6]   ;;  %s4043_s25 = scalar_lea.hbm %s4609_s1, 128 }
   0x9   :  { %s45_s22 = sshll.u32 %s4253_s21, 4  ;;  %p4044_p0 = scmp.ne.s32.totalorder %s4609_s1, %s4043_s25  ;;  %s46_s22 = int_to_ptr.vmem [resolvable:$true] %s45_s22 }
   0xa   :  { %p4047_p1 = scmp.lt.u32.totalorder %s4043_s25, %s4609_s1 }
   0xc   :  { %p4049_p2 = pnand %p4047_p1, %p4044_p0 }
   0xe   :  { %4052 = shalt.err (!%p4049_p2)
}
   0xf   :  { %s4053_s30 = scalar_lea.vmem %s46_s22, 128  ;;  %p4058_p4 = scmp.lt.s32.totalorder %s46_s22, %s46_s22 }
  0x10   :  { %p4054_p3 = scmp.ne.s32.totalorder %s46_s22, %s4053_s30  ;;  %p4059_p5 = scmp.lt.s32.totalorder %s4053_s30, %s4053_s30 }
  0x12   :  { %p4060_p6 = por %p4059_p5, %p4058_p4 }
  0x14   :  { %p4061_p7 = pnand %p4060_p6, %p4054_p3 }
  0x16   :  { %4064 = shalt.err (!%p4061_p7)
}
  0x17   :  { %s4627_s0 = smov 64   ;;  %s4255_s17 = smov 4  }
  0x18   :  { %51 = dma.hbm_to_vmem [thread:$0]  %s4609_s1, 128, %s46_s22, [#allocation7], %s4627_s0, %s4627_s0, %s4255_s17  }
  0x19   :  { %s4256_s20 = smov [#allocation9]   ;;  %s4257_s23 = smov [#allocation12]  }
  0x1a   :  { %s69_s21 = sshll.u32 %s4256_s20, 4  ;;  %s93_s24 = sshll.u32 %s4257_s23, 4  ;;  %s70_s21 = int_to_ptr.vmem [resolvable:$true] %s69_s21  ;;  %s94_s24 = int_to_ptr.vmem [resolvable:$true] %s93_s24 }
  0x1b   :  { %s4065_s27 = scalar_lea.hbm %s4611_s3, 512 }
  0x1c   :  { %p4066_p8 = scmp.ne.s32.totalorder %s4611_s3, %s4065_s27  ;;  %p4069_p9 = scmp.lt.u32.totalorder %s4065_s27, %s4611_s3 }
  0x1e   :  { %p4071_p10 = pnand %p4069_p9, %p4066_p8 }
  0x20   :  { %4074 = shalt.err (!%p4071_p10)
}
  0x21   :  { %s4075_s1 = scalar_lea.vmem %s70_s21, 512  ;;  %p4080_p12 = scmp.lt.s32.totalorder %s70_s21, %s70_s21 }
  0x22   :  { %p4076_p11 = scmp.ne.s32.totalorder %s70_s21, %s4075_s1  ;;  %p4081_p13 = scmp.lt.s32.totalorder %s4075_s1, %s4075_s1 }
  0x24   :  { %p4082_p0 = por %p4081_p13, %p4080_p12 }
  0x26   :  { %p4083_p1 = pnand %p4082_p0, %p4076_p11 }
  0x28   :  { %4086 = shalt.err (!%p4083_p1)
}
  0x29   :  { %s4258_s22 = smov 256   ;;  %s4259_s18 = smov 16  }
  0x2a   :  { %75 = dma.hbm_to_vmem [thread:$0]  %s4611_s3, 512, %s70_s21, [#allocation10], %s4258_s22, %s4258_s22, %s4259_s18  }
  0x2b   :  { %s4087_s25 = scalar_lea.hbm %s4613_s5, 16384 }
  0x2c   :  { %p4088_p2 = scmp.ne.s32.totalorder %s4613_s5, %s4087_s25  ;;  %p4091_p3 = scmp.lt.u32.totalorder %s4087_s25, %s4613_s5 }
  0x2e   :  { %p4093_p4 = pnand %p4091_p3, %p4088_p2 }
  0x30   :  { %4096 = shalt.err (!%p4093_p4)
}
  0x31   :  { %s4097_s30 = scalar_lea.vmem %s94_s24, 16384  ;;  %p4102_p6 = scmp.lt.s32.totalorder %s94_s24, %s94_s24 }
  0x32   :  { %p4098_p5 = scmp.ne.s32.totalorder %s94_s24, %s4097_s30  ;;  %p4103_p7 = scmp.lt.s32.totalorder %s4097_s30, %s4097_s30 }
  0x34   :  { %p4104_p8 = por %p4103_p7, %p4102_p6 }
  0x36   :  { %p4105_p9 = pnand %p4104_p8, %p4098_p5 }
  0x38   :  { %4108 = shalt.err (!%p4105_p9)
}
  0x39   :  { %99 = dma.hbm_to_vmem [thread:$0]  %s4613_s5, 16384, %s94_s24, [#allocation13], %s4258_s22, %s4258_s22, %s4259_s18  }
  0x3a   :  { %s4260_s1 = smov [#allocation3]   ;;  %s4261_s20 = smov [#allocation8]  }
  0x3b   :  { %s33_s19 = sshll.u32 %s4260_s1, 4  ;;  %s57_s16 = sshll.u32 %s4261_s20, 4  ;;  %s34_s19 = int_to_ptr.vmem [resolvable:$true] %s33_s19  ;;  %s58_s16 = int_to_ptr.vmem [resolvable:$true] %s57_s16 }
  0x3c   :  { %s4630_s26 = sld [smem:[#allocation24_spill]] }
  0x42   :  { %s4109_s27 = scalar_lea.hbm %s4630_s26, 128 }
  0x43   :  { %p4110_p10 = scmp.ne.s32.totalorder %s4630_s26, %s4109_s27  ;;  %p4113_p11 = scmp.lt.u32.totalorder %s4109_s27, %s4630_s26 }
  0x45   :  { %p4115_p12 = pnand %p4113_p11, %p4110_p10 }
  0x47   :  { %4118 = shalt.err (!%p4115_p12)
}
  0x48   :  { %s4119_s5 = scalar_lea.vmem %s34_s19, 128  ;;  %p4124_p0 = scmp.lt.s32.totalorder %s34_s19, %s34_s19 }
  0x49   :  { %p4120_p13 = scmp.ne.s32.totalorder %s34_s19, %s4119_s5  ;;  %p4125_p1 = scmp.lt.s32.totalorder %s4119_s5, %s4119_s5 }
  0x4b   :  { %p4126_p2 = por %p4125_p1, %p4124_p0 }
  0x4d   :  { %p4127_p3 = pnand %p4126_p2, %p4120_p13 }
  0x4f   :  { %4130 = shalt.err (!%p4127_p3)
}
  0x50   :  { %s4631_s24 = smov 64   ;;  %s4131_s20 = scalar_lea.hbm %s4610_s2, 512 }
  0x51   :  { %39 = dma.hbm_to_vmem [thread:$0]  %s4630_s26, 128, %s34_s19, [#allocation4], %s4631_s24, %s4631_s24, %s4255_s17  }
  0x52   :  { %p4132_p4 = scmp.ne.s32.totalorder %s4610_s2, %s4131_s20  ;;  %p4135_p5 = scmp.lt.u32.totalorder %s4131_s20, %s4610_s2 }
  0x54   :  { %p4137_p6 = pnand %p4135_p5, %p4132_p4 }
  0x56   :  { %4140 = shalt.err (!%p4137_p6)
}
  0x57   :  { %s4141_s29 = scalar_lea.vmem %s58_s16, 512  ;;  %p4146_p8 = scmp.lt.s32.totalorder %s58_s16, %s58_s16 }
  0x58   :  { %p4142_p7 = scmp.ne.s32.totalorder %s58_s16, %s4141_s29  ;;  %p4147_p9 = scmp.lt.s32.totalorder %s4141_s29, %s4141_s29 }
  0x5a   :  { %p4148_p10 = por %p4147_p9, %p4146_p8 }
  0x5c   :  { %p4149_p11 = pnand %p4148_p10, %p4142_p7 }
  0x5e   :  { %4152 = shalt.err (!%p4149_p11)
}
  0x5f   :  { %63 = dma.hbm_to_vmem [thread:$0]  %s4610_s2, 512, %s58_s16, [#allocation7], %s4258_s22, %s4258_s22, %s4259_s18  }
  0x60   :  { %s4262_s26 = smov [#allocation11]   ;;  %s4263_s5 = smov [#allocation14]  }
  0x61   :  { %s81_s30 = sshll.u32 %s4262_s26, 4  ;;  %s107_s24 = sshll.u32 %s4263_s5, 4  ;;  %s82_s30 = int_to_ptr.vmem [resolvable:$true] %s81_s30  ;;  %s108_s24 = int_to_ptr.vmem [resolvable:$true] %s107_s24 }
  0x62   :  { %s4153_s1 = scalar_lea.hbm %s4612_s4, 16384 }
  0x63   :  { %p4154_p12 = scmp.ne.s32.totalorder %s4612_s4, %s4153_s1  ;;  %p4157_p13 = scmp.lt.u32.totalorder %s4153_s1, %s4612_s4 }
  0x65   :  { %p4159_p0 = pnand %p4157_p13, %p4154_p12 }
  0x67   :  { %4162 = shalt.err (!%p4159_p0)
}
  0x68   :  { %s4163_s2 = scalar_lea.vmem %s82_s30, 16384  ;;  %p4168_p2 = scmp.lt.s32.totalorder %s82_s30, %s82_s30 }
  0x69   :  { %p4164_p1 = scmp.ne.s32.totalorder %s82_s30, %s4163_s2  ;;  %p4169_p3 = scmp.lt.s32.totalorder %s4163_s2, %s4163_s2 }
  0x6b   :  { %p4170_p4 = por %p4169_p3, %p4168_p2 }
  0x6d   :  { %p4171_p5 = pnand %p4170_p4, %p4164_p1 }
  0x6f   :  { %4174 = shalt.err (!%p4171_p5)
}
  0x70   :  { %87 = dma.hbm_to_vmem [thread:$0]  %s4612_s4, 16384, %s82_s30, [#allocation10], %s4258_s22, %s4258_s22, %s4259_s18  }
  0x71   :  { %s4175_s17 = scalar_lea.hbm %s4615_s7, 8192 }
  0x72   :  { %p4176_p6 = scmp.ne.s32.totalorder %s4615_s7, %s4175_s17  ;;  %p4179_p7 = scmp.lt.u32.totalorder %s4175_s17, %s4615_s7 }
  0x74   :  { %p4181_p8 = pnand %p4179_p7, %p4176_p6 }
  0x76   :  { %4184 = shalt.err (!%p4181_p8)
}
  0x77   :  { %s4185_s21 = scalar_lea.vmem %s108_s24, 8192  ;;  %p4190_p10 = scmp.lt.s32.totalorder %s108_s24, %s108_s24 }
  0x78   :  { %p4186_p9 = scmp.ne.s32.totalorder %s108_s24, %s4185_s21  ;;  %p4191_p11 = scmp.lt.s32.totalorder %s4185_s21, %s4185_s21 }
  0x7a   :  { %p4192_p12 = por %p4191_p11, %p4190_p10 }
  0x7c   :  { %p4193_p13 = pnand %p4192_p12, %p4186_p9 }
  0x7e   :  { %4196 = shalt.err (!%p4193_p13)
}
  0x7f   :  { %s4264_s4 = smov 128   ;;  %s4265_s22 = smov 8  }
  0x80   :  { %113 = dma.hbm_to_vmem [thread:$0]  %s4615_s7, 8192, %s108_s24, [#allocation13], %s4264_s4, %s4264_s4, %s4265_s22  }
  0x81   :  { %s4266_s1 = smov [#allocation15]   ;;  %s4197_s25 = scalar_lea.hbm %s4616_s8, 32 }
  0x82   :  { %s120_s0 = sshll.u32 %s4266_s1, 4  ;;  %p4198_p0 = scmp.ne.s32.totalorder %s4616_s8, %s4197_s25  ;;  %s121_s0 = int_to_ptr.vmem [resolvable:$true] %s120_s0 }
  0x83   :  { %p4201_p1 = scmp.lt.u32.totalorder %s4197_s25, %s4616_s8 }
  0x85   :  { %p4203_p2 = pnand %p4201_p1, %p4198_p0 }
  0x87   :  { %4206 = shalt.err (!%p4203_p2)
}
  0x88   :  { %s4207_s29 = scalar_lea.vmem %s121_s0, 32  ;;  %p4212_p4 = scmp.lt.s32.totalorder %s121_s0, %s121_s0 }
  0x89   :  { %p4208_p3 = scmp.ne.s32.totalorder %s121_s0, %s4207_s29  ;;  %p4213_p5 = scmp.lt.s32.totalorder %s4207_s29, %s4207_s29 }
  0x8b   :  { %p4214_p6 = por %p4213_p5, %p4212_p4 }
  0x8d   :  { %p4215_p7 = pnand %p4214_p6, %p4208_p3 }
  0x8f   :  { %4218 = shalt.err (!%p4215_p7)
}
  0x90   :  { %123 = dma.hbm_to_vmem [thread:$0]  %s4616_s8, 32, %s121_s0, [#allocation16]  }
  0x91   :  { %4241 = dma.done.wait [#allocation4], 128  }
  0x92   :  { %4242 = vsyncadd [#allocation4], 4294967168 }
  0x93   :  { %4243 = dma.done.wait [#allocation7], 640  }
  0x94   :  { %4244 = vsyncadd [#allocation7], 4294966656 }
  0x95   :  { %4245 = dma.done.wait [#allocation10], 16896  }
  0x96   :  { %4246 = vsyncadd [#allocation10], 4294950400 }
  0x97   :  { %4247 = dma.done.wait [#allocation13], 24576  }
  0x98   :  { %4248 = vsyncadd [#allocation13], 4294942720 }
  0x99   :  { %4249 = dma.done.wait [#allocation16], 32  }
  0x9a   :  { %4250 = vsyncadd [#allocation16], 4294967264  ;;  %v3527_v0 = vld [vmem:[#allocation12 + $0x4] ss:$16 sps:$4 sm:$0xff]   ;;  %v3529_v1 = vld [vmem:[#allocation12 + $0xc] ss:$16 sps:$4 sm:$0xff]  }
  0x9b   :  { %1097 = vmatprep.subr.bf16.mxu0 %v3527_v0  ;;  %v3531_v2 = vld [vmem:[#allocation12] ss:$16 sps:$4 sm:$0xff]   ;;  %v3532_v3 = vld [vmem:[#allocation12 + $0x8] ss:$16 sps:$4 sm:$0xff]   ;;  %1183 = vmatprep.subr.bf16.mxu1 %v3529_v1  ;;  %v3533_v4 = vld [vmem:[#allocation12 + $0x24] ss:$16 sps:$4 sm:$0xff]  }
  0x9c   :  { %1098 = vmatpush1.bf16.msra.mxu0 %v3531_v2  ;;  %1184 = vmatpush1.bf16.msra.mxu1 %v3532_v3  ;;  %v3535_v5 = vld [vmem:[#allocation12 + $0x2c] ss:$16 sps:$4 sm:$0xff]   ;;  %v3537_v6 = vld [vmem:[#allocation12 + $0x20] ss:$16 sps:$4 sm:$0xff]   ;;  %v3538_v7 = vld [vmem:[#allocation12 + $0x28] ss:$16 sps:$4 sm:$0xff]  }
  0x9d   :  { %1099 = vmatprep.subr.bf16.mxu0 %v3533_v4  ;;  %1185 = vmatprep.subr.bf16.mxu1 %v3535_v5  ;;  %v3539_v8 = vld [vmem:[#allocation12 + $0x44] ss:$16 sps:$4 sm:$0xff]   ;;  %v3541_v9 = vld [vmem:[#allocation12 + $0x4c] ss:$16 sps:$4 sm:$0xff]   ;;  %v3543_v10 = vld [vmem:[#allocation12 + $0x40] ss:$16 sps:$4 sm:$0xff]  }
  0x9e   :  { %v3544_v11 = vld [vmem:[#allocation12 + $0x48] ss:$16 sps:$4 sm:$0xff]   ;;  %v3545_v12 = vld [vmem:[#allocation12 + $0x64] ss:$16 sps:$4 sm:$0xff]   ;;  %v3547_v13 = vld [vmem:[#allocation12 + $0x6c] ss:$16 sps:$4 sm:$0xff]  }
  0x9f   :  { %v3549_v14 = vld [vmem:[#allocation12 + $0x60] ss:$16 sps:$4 sm:$0xff]   ;;  %v3550_v15 = vld [vmem:[#allocation12 + $0x68] ss:$16 sps:$4 sm:$0xff]   ;;  %v3551_v16 = vld [vmem:[#allocation12 + $0x84] ss:$16 sps:$4 sm:$0xff]  }
  0xa0   :  { %1100 = vmatpush1.bf16.msra.mxu0 %v3537_v6  ;;  %1186 = vmatpush1.bf16.msra.mxu1 %v3538_v7  ;;  %v3553_v17 = vld [vmem:[#allocation12 + $0x8c] ss:$16 sps:$4 sm:$0xff]   ;;  %v3555_v18 = vld [vmem:[#allocation12 + $0x80] ss:$16 sps:$4 sm:$0xff]   ;;  %v3556_v19 = vld [vmem:[#allocation12 + $0x88] ss:$16 sps:$4 sm:$0xff]  }
  0xa1   :  { %1101 = vmatprep.subr.bf16.mxu0 %v3539_v8  ;;  %1187 = vmatprep.subr.bf16.mxu1 %v3541_v9  ;;  %v3557_v20 = vld [vmem:[#allocation12 + $0xa4] ss:$16 sps:$4 sm:$0xff]   ;;  %v3559_v21 = vld [vmem:[#allocation12 + $0xac] ss:$16 sps:$4 sm:$0xff]   ;;  %v3561_v22 = vld [vmem:[#allocation12 + $0xa0] ss:$16 sps:$4 sm:$0xff]  }
  0xa2   :  { %v3562_v23 = vld [vmem:[#allocation12 + $0xa8] ss:$16 sps:$4 sm:$0xff]   ;;  %v3563_v24 = vld [vmem:[#allocation12 + $0xc4] ss:$16 sps:$4 sm:$0xff]   ;;  %v3565_v25 = vld [vmem:[#allocation12 + $0xcc] ss:$16 sps:$4 sm:$0xff]  }
  0xa3   :  { %v3567_v26 = vld [vmem:[#allocation12 + $0xc0] ss:$16 sps:$4 sm:$0xff]   ;;  %v3568_v27 = vld [vmem:[#allocation12 + $0xc8] ss:$16 sps:$4 sm:$0xff]   ;;  %v3569_v28 = vld [vmem:[#allocation12 + $0xe4] ss:$16 sps:$4 sm:$0xff]  }
  0xa4   :  { %1102 = vmatpush1.bf16.msra.mxu0 %v3543_v10  ;;  %1188 = vmatpush1.bf16.msra.mxu1 %v3544_v11  ;;  %v3571_v29 = vld [vmem:[#allocation12 + $0xec] ss:$16 sps:$4 sm:$0xff]   ;;  %v3573_v30 = vld [vmem:[#allocation12 + $0xe0] ss:$16 sps:$4 sm:$0xff]   ;;  %v3574_v31 = vld [vmem:[#allocation12 + $0xe8] ss:$16 sps:$4 sm:$0xff]  }
  0xa5   :  { %1103 = vmatprep.subr.bf16.mxu0 %v3545_v12  ;;  %1189 = vmatprep.subr.bf16.mxu1 %v3547_v13  ;;  %v3575_v32 = vld [vmem:[#allocation12 + $0x104] ss:$16 sps:$4 sm:$0xff]   ;;  %v3577_v33 = vld [vmem:[#allocation12 + $0x10c] ss:$16 sps:$4 sm:$0xff]   ;;  %v3579_v34 = vld [vmem:[#allocation12 + $0x100] ss:$16 sps:$4 sm:$0xff]  }
  0xa6   :  { %v3580_v35 = vld [vmem:[#allocation12 + $0x108] ss:$16 sps:$4 sm:$0xff]   ;;  %v3581_v36 = vld [vmem:[#allocation12 + $0x124] ss:$16 sps:$4 sm:$0xff]   ;;  %v3583_v37 = vld [vmem:[#allocation12 + $0x12c] ss:$16 sps:$4 sm:$0xff]  }
  0xa7   :  { %v3585_v38 = vld [vmem:[#allocation12 + $0x120] ss:$16 sps:$4 sm:$0xff]   ;;  %v3586_v39 = vld [vmem:[#allocation12 + $0x128] ss:$16 sps:$4 sm:$0xff]   ;;  %v3587_v40 = vld [vmem:[#allocation12 + $0x144] ss:$16 sps:$4 sm:$0xff]  }
  0xa8   :  { %1104 = vmatpush1.bf16.msra.mxu0 %v3549_v14  ;;  %1190 = vmatpush1.bf16.msra.mxu1 %v3550_v15  ;;  %v3589_v41 = vld [vmem:[#allocation12 + $0x14c] ss:$16 sps:$4 sm:$0xff]   ;;  %v3591_v42 = vld [vmem:[#allocation12 + $0x140] ss:$16 sps:$4 sm:$0xff]   ;;  %v3592_v43 = vld [vmem:[#allocation12 + $0x148] ss:$16 sps:$4 sm:$0xff]  }
  0xa9   :  { %1105 = vmatprep.subr.bf16.mxu0 %v3551_v16  ;;  %1191 = vmatprep.subr.bf16.mxu1 %v3553_v17  ;;  %v3593_v44 = vld [vmem:[#allocation12 + $0x164] ss:$16 sps:$4 sm:$0xff]   ;;  %v3595_v45 = vld [vmem:[#allocation12 + $0x16c] ss:$16 sps:$4 sm:$0xff]   ;;  %v3597_v46 = vld [vmem:[#allocation12 + $0x160] ss:$16 sps:$4 sm:$0xff]  }
  0xaa   :  { %v3598_v47 = vld [vmem:[#allocation12 + $0x168] ss:$16 sps:$4 sm:$0xff]   ;;  %v3625_v48 = vld [vmem:[#allocation9 + $0x4] ss:$16 sps:$4 sm:$0xff]   ;;  %v3601_v50 = vld [vmem:[#allocation12 + $0x18c] ss:$16 sps:$4 sm:$0xff]  }
  0xab   :  { %v3599_v49 = vld [vmem:[#allocation12 + $0x184] ss:$16 sps:$4 sm:$0xff]   ;;  %1129 = vmatprep.mubr.bf16.mxu0 %v3625_v48  ;;  %1215 = vmatprep.mubr.bf16.mxu1 %v3625_v48  ;;  %v3603_v51 = vld [vmem:[#allocation12 + $0x180] ss:$16 sps:$4 sm:$0xff]   ;;  %v3604_v52 = vld [vmem:[#allocation12 + $0x188] ss:$16 sps:$4 sm:$0xff]  }
  0xac   :  { %1106 = vmatpush1.bf16.msra.mxu0 %v3555_v18  ;;  %1192 = vmatpush1.bf16.msra.mxu1 %v3556_v19  ;;  %v3605_v53 = vld [vmem:[#allocation12 + $0x1a4] ss:$16 sps:$4 sm:$0xff]   ;;  %v3607_v54 = vld [vmem:[#allocation12 + $0x1ac] ss:$16 sps:$4 sm:$0xff]   ;;  %v3609_v55 = vld [vmem:[#allocation12 + $0x1a0] ss:$16 sps:$4 sm:$0xff]  }
  0xad   :  { %1107 = vmatprep.subr.bf16.mxu0 %v3557_v20  ;;  %1193 = vmatprep.subr.bf16.mxu1 %v3559_v21  ;;  %v3610_v56 = vld [vmem:[#allocation12 + $0x1a8] ss:$16 sps:$4 sm:$0xff]   ;;  %v3611_v57 = vld [vmem:[#allocation12 + $0x1c4] ss:$16 sps:$4 sm:$0xff]   ;;  %v3613_v58 = vld [vmem:[#allocation12 + $0x1cc] ss:$16 sps:$4 sm:$0xff]  }
  0xae   :  { %v3615_v59 = vld [vmem:[#allocation12 + $0x1c0] ss:$16 sps:$4 sm:$0xff]   ;;  %v3616_v60 = vld [vmem:[#allocation12 + $0x1c8] ss:$16 sps:$4 sm:$0xff]   ;;  %v3617_v61 = vld [vmem:[#allocation12 + $0x1e4] ss:$16 sps:$4 sm:$0xff]  }
  0xaf   :  { %v3619_v62 = vld [vmem:[#allocation12 + $0x1ec] ss:$16 sps:$4 sm:$0xff]   ;;  %v3621_v63 = vld [vmem:[#allocation12 + $0x1e0] ss:$16 sps:$4 sm:$0xff]   ;;  %v3622_v0 = vld [vmem:[#allocation12 + $0x1e8] ss:$16 sps:$4 sm:$0xff]  }
  0xb0   :  { %1108 = vmatpush1.bf16.msra.mxu0 %v3561_v22  ;;  %1194 = vmatpush1.bf16.msra.mxu1 %v3562_v23  ;;  %v3628_v1 = vld [vmem:[#allocation12 + $0x204] ss:$16 sps:$4 sm:$0xff]   ;;  %v3631_v2 = vld [vmem:[#allocation12 + $0x20c] ss:$16 sps:$4 sm:$0xff]   ;;  %v3623_v3 = vld [vmem:[#allocation9] ss:$16 sps:$4 sm:$0xff]  }
  0xb1   :  { %1109 = vmatprep.subr.bf16.mxu0 %v3563_v24  ;;  %1195 = vmatprep.subr.bf16.mxu1 %v3565_v25  ;;  %v3626_v4 = vld [vmem:[#allocation12 + $0x200] ss:$16 sps:$4 sm:$0xff]   ;;  %v3629_v5 = vld [vmem:[#allocation12 + $0x208] ss:$16 sps:$4 sm:$0xff]   ;;  %v3634_v6 = vld [vmem:[#allocation12 + $0x224] ss:$16 sps:$4 sm:$0xff]  }
  0xb2   :  { %v3637_v7 = vld [vmem:[#allocation12 + $0x22c] ss:$16 sps:$4 sm:$0xff]   ;;  %v3632_v8 = vld [vmem:[#allocation12 + $0x220] ss:$16 sps:$4 sm:$0xff]   ;;  %v3635_v9 = vld [vmem:[#allocation12 + $0x228] ss:$16 sps:$4 sm:$0xff]  }
  0xb3   :  { %v3640_v10 = vld [vmem:[#allocation12 + $0x244] ss:$16 sps:$4 sm:$0xff]   ;;  %v3643_v11 = vld [vmem:[#allocation12 + $0x24c] ss:$16 sps:$4 sm:$0xff]   ;;  %v3638_v12 = vld [vmem:[#allocation12 + $0x240] ss:$16 sps:$4 sm:$0xff]  }
  0xb4   :  { %1110 = vmatpush1.bf16.msra.mxu0 %v3567_v26  ;;  %1196 = vmatpush1.bf16.msra.mxu1 %v3568_v27  ;;  %v3641_v13 = vld [vmem:[#allocation12 + $0x248] ss:$16 sps:$4 sm:$0xff]   ;;  %v3646_v14 = vld [vmem:[#allocation12 + $0x264] ss:$16 sps:$4 sm:$0xff]   ;;  %v3649_v15 = vld [vmem:[#allocation12 + $0x26c] ss:$16 sps:$4 sm:$0xff]  }
  0xb5   :  { %1111 = vmatprep.subr.bf16.mxu0 %v3569_v28  ;;  %1197 = vmatprep.subr.bf16.mxu1 %v3571_v29  ;;  %v3644_v16 = vld [vmem:[#allocation12 + $0x260] ss:$16 sps:$4 sm:$0xff]   ;;  %v3647_v17 = vld [vmem:[#allocation12 + $0x268] ss:$16 sps:$4 sm:$0xff]   ;;  %v3652_v18 = vld [vmem:[#allocation12 + $0x284] ss:$16 sps:$4 sm:$0xff]  }
  0xb6   :  { %v3655_v19 = vld [vmem:[#allocation12 + $0x28c] ss:$16 sps:$4 sm:$0xff]   ;;  %v3650_v20 = vld [vmem:[#allocation12 + $0x280] ss:$16 sps:$4 sm:$0xff]   ;;  %v3653_v21 = vld [vmem:[#allocation12 + $0x288] ss:$16 sps:$4 sm:$0xff]  }
  0xb7   :  { %v3658_v22 = vld [vmem:[#allocation12 + $0x2a4] ss:$16 sps:$4 sm:$0xff]   ;;  %v3661_v23 = vld [vmem:[#allocation12 + $0x2ac] ss:$16 sps:$4 sm:$0xff]   ;;  %v3656_v24 = vld [vmem:[#allocation12 + $0x2a0] ss:$16 sps:$4 sm:$0xff]  }
  0xb8   :  { %1112 = vmatpush1.bf16.msra.mxu0 %v3573_v30  ;;  %1198 = vmatpush1.bf16.msra.mxu1 %v3574_v31  ;;  %v3659_v25 = vld [vmem:[#allocation12 + $0x2a8] ss:$16 sps:$4 sm:$0xff]   ;;  %v3664_v26 = vld [vmem:[#allocation12 + $0x2c4] ss:$16 sps:$4 sm:$0xff]   ;;  %v3667_v27 = vld [vmem:[#allocation12 + $0x2cc] ss:$16 sps:$4 sm:$0xff]  }
  0xb9   :  { %1113 = vmatprep.subr.bf16.mxu0 %v3575_v32  ;;  %1199 = vmatprep.subr.bf16.mxu1 %v3577_v33  ;;  %v3662_v28 = vld [vmem:[#allocation12 + $0x2c0] ss:$16 sps:$4 sm:$0xff]   ;;  %v3665_v29 = vld [vmem:[#allocation12 + $0x2c8] ss:$16 sps:$4 sm:$0xff]   ;;  %v3724_v30 = vld [vmem:[#allocation9 + $0xc] ss:$16 sps:$4 sm:$0xff]  }
  0xba   :  { %v3670_v31 = vld [vmem:[#allocation12 + $0x2e4] ss:$16 sps:$4 sm:$0xff]   ;;  %v3673_v32 = vld [vmem:[#allocation12 + $0x2ec] ss:$16 sps:$4 sm:$0xff]   ;;  %v3668_v33 = vld [vmem:[#allocation12 + $0x2e0] ss:$16 sps:$4 sm:$0xff]  }
  0xbb   :  { %v3697_v48 = vld [vmem:[#allocation12 + $0x36c] ss:$16 sps:$4 sm:$0xff]   ;;  %vm4268_vm0 = vmmov 0   ;;  %vm2930_vm1 = vcmask 523264   ;;  %s4269_s21 = smov [#allocation17]   ;;  %vm3026_vm2 = vcmask 122880  }
  0xbc   :  { %1114 = vmatpush1.bf16.msra.mxu0 %v3579_v34  ;;  %1200 = vmatpush1.bf16.msra.mxu1 %v3580_v35  ;;  %v3671_v34 = vld [vmem:[#allocation12 + $0x2e8] ss:$16 sps:$4 sm:$0xff]   ;;  %v3676_v35 = vld [vmem:[#allocation12 + $0x304] ss:$16 sps:$4 sm:$0xff]   ;;  %s3034_s4 = sshll.u32 %s4269_s21, 4  ;;  %s3035_s4 = int_to_ptr.vmem [resolvable:$true] %s3034_s4 }
  0xbd   :  { %1115 = vmatprep.subr.bf16.mxu0 %v3581_v36  ;;  %1201 = vmatprep.subr.bf16.mxu1 %v3583_v37  ;;  %v3679_v36 = vld [vmem:[#allocation12 + $0x30c] ss:$16 sps:$4 sm:$0xff]   ;;  %v3674_v37 = vld [vmem:[#allocation12 + $0x300] ss:$16 sps:$4 sm:$0xff]   ;;  %s4223_s22 = scalar_lea.vmem %s3035_s4, 32  ;;  %p4224_p9 = scmp.lt.s32.totalorder %s3035_s4, %s3035_s4 }
  0xc0   :  { %1116 = vmatpush1.bf16.msra.mxu0 %v3585_v38  ;;  %1202 = vmatpush1.bf16.msra.mxu1 %v3586_v39  ;;  %v3677_v38 = vld [vmem:[#allocation12 + $0x308] ss:$16 sps:$4 sm:$0xff]   ;;  %v3682_v39 = vld [vmem:[#allocation12 + $0x324] ss:$16 sps:$4 sm:$0xff]  }
  0xc1   :  { %1117 = vmatprep.subr.bf16.mxu0 %v3587_v40  ;;  %1203 = vmatprep.subr.bf16.mxu1 %v3589_v41  ;;  %v3685_v40 = vld [vmem:[#allocation12 + $0x32c] ss:$16 sps:$4 sm:$0xff]   ;;  %v3680_v41 = vld [vmem:[#allocation12 + $0x320] ss:$16 sps:$4 sm:$0xff]  }
  0xc4   :  { %1118 = vmatpush1.bf16.msra.mxu0 %v3591_v42  ;;  %1204 = vmatpush1.bf16.msra.mxu1 %v3592_v43  ;;  %v3683_v42 = vld [vmem:[#allocation12 + $0x328] ss:$16 sps:$4 sm:$0xff]   ;;  %v3688_v43 = vld [vmem:[#allocation12 + $0x344] ss:$16 sps:$4 sm:$0xff]  }
  0xc5   :  { %1119 = vmatprep.subr.bf16.mxu0 %v3593_v44  ;;  %1205 = vmatprep.subr.bf16.mxu1 %v3595_v45  ;;  %v3691_v44 = vld [vmem:[#allocation12 + $0x34c] ss:$16 sps:$4 sm:$0xff]   ;;  %v3686_v45 = vld [vmem:[#allocation12 + $0x340] ss:$16 sps:$4 sm:$0xff]  }
  0xc8   :  { %1120 = vmatpush1.bf16.msra.mxu0 %v3597_v46  ;;  %1206 = vmatpush1.bf16.msra.mxu1 %v3598_v47  ;;  %v3689_v46 = vld [vmem:[#allocation12 + $0x348] ss:$16 sps:$4 sm:$0xff]   ;;  %v3694_v47 = vld [vmem:[#allocation12 + $0x364] ss:$16 sps:$4 sm:$0xff]  }
  0xc9   :  { %1121 = vmatprep.subr.bf16.mxu0 %v3599_v49  ;;  %1207 = vmatprep.subr.bf16.mxu1 %v3601_v50  ;;  %v3692_v49 = vld [vmem:[#allocation12 + $0x360] ss:$16 sps:$4 sm:$0xff]   ;;  %v3695_v50 = vld [vmem:[#allocation12 + $0x368] ss:$16 sps:$4 sm:$0xff]  }
  0xcc   :  { %1122 = vmatpush1.bf16.msra.mxu0 %v3603_v51  ;;  %1208 = vmatpush1.bf16.msra.mxu1 %v3604_v52  ;;  %v3700_v51 = vld [vmem:[#allocation12 + $0x384] ss:$16 sps:$4 sm:$0xff]   ;;  %v3703_v52 = vld [vmem:[#allocation12 + $0x38c] ss:$16 sps:$4 sm:$0xff]  }
  0xcd   :  { %1123 = vmatprep.subr.bf16.mxu0 %v3605_v53  ;;  %1209 = vmatprep.subr.bf16.mxu1 %v3607_v54  ;;  %v3698_v53 = vld [vmem:[#allocation12 + $0x380] ss:$16 sps:$4 sm:$0xff]   ;;  %v3701_v54 = vld [vmem:[#allocation12 + $0x388] ss:$16 sps:$4 sm:$0xff]  }
  0xd0   :  { %1124 = vmatpush1.bf16.msra.mxu0 %v3609_v55  ;;  %1210 = vmatpush1.bf16.msra.mxu1 %v3610_v56  ;;  %v3706_v55 = vld [vmem:[#allocation12 + $0x3a4] ss:$16 sps:$4 sm:$0xff]   ;;  %v3709_v56 = vld [vmem:[#allocation12 + $0x3ac] ss:$16 sps:$4 sm:$0xff]  }
  0xd1   :  { %1125 = vmatprep.subr.bf16.mxu0 %v3611_v57  ;;  %1211 = vmatprep.subr.bf16.mxu1 %v3613_v58  ;;  %v3704_v57 = vld [vmem:[#allocation12 + $0x3a0] ss:$16 sps:$4 sm:$0xff]   ;;  %v3707_v58 = vld [vmem:[#allocation12 + $0x3a8] ss:$16 sps:$4 sm:$0xff]  }
  0xd4   :  { %1126 = vmatpush1.bf16.msra.mxu0 %v3615_v59  ;;  %1212 = vmatpush1.bf16.msra.mxu1 %v3616_v60  ;;  %v3712_v59 = vld [vmem:[#allocation12 + $0x3c4] ss:$16 sps:$4 sm:$0xff]   ;;  %v3715_v60 = vld [vmem:[#allocation12 + $0x3cc] ss:$16 sps:$4 sm:$0xff]  }
  0xd5   :  { %1127 = vmatprep.subr.bf16.mxu0 %v3617_v61  ;;  %1213 = vmatprep.subr.bf16.mxu1 %v3619_v62  ;;  %v3710_v61 = vld [vmem:[#allocation12 + $0x3c0] ss:$16 sps:$4 sm:$0xff]   ;;  %v3713_v62 = vld [vmem:[#allocation12 + $0x3c8] ss:$16 sps:$4 sm:$0xff]  }
  0xd8   :  { %1128 = vmatpush1.bf16.msra.mxu0 %v3621_v63  ;;  %1214 = vmatpush1.bf16.msra.mxu1 %v3622_v0  ;;  %v3718_v63 = vld [vmem:[#allocation12 + $0x3e4] ss:$16 sps:$4 sm:$0xff]   ;;  %v3721_v0 = vld [vmem:[#allocation12 + $0x3ec] ss:$16 sps:$4 sm:$0xff]  }
  0xd9   :  { %1140 = vmatprep.subr.bf16.mxu0 %v3628_v1  ;;  %1226 = vmatprep.subr.bf16.mxu1 %v3631_v2  ;;  %v3716_v1 = vld [vmem:[#allocation12 + $0x3e0] ss:$16 sps:$4 sm:$0xff]   ;;  %v3719_v2 = vld [vmem:[#allocation12 + $0x3e8] ss:$16 sps:$4 sm:$0xff]  }
  0xdb   :  { %1130 = vmatmul.mubr.bf16.vlgmr.msra.gmra.mrb[0].mxu0 %v3623_v3  ;;  %1216 = vmatmul.mubr.bf16.vlgmr.msra.gmra.mrb[0].mxu1 %v3623_v3  ;;  %v3727_v3 = vld [vmem:[#allocation11 + $0x4] ss:$16 sps:$4 sm:$0xff]  }
  0xdc   :  { %1141 = vmatpush1.bf16.msra.mxu0 %v3626_v4  ;;  %1227 = vmatpush1.bf16.msra.mxu1 %v3629_v5  ;;  %v3730_v4 = vld [vmem:[#allocation11 + $0xc] ss:$16 sps:$4 sm:$0xff]   ;;  %v3722_v5 = vld [vmem:[#allocation9 + $0x8] ss:$16 sps:$4 sm:$0xff]  }
  0xdd   :  { %1142 = vmatprep.subr.bf16.mxu0 %v3634_v6  ;;  %1228 = vmatprep.subr.bf16.mxu1 %v3637_v7  ;;  %v3725_v6 = vld [vmem:[#allocation11] ss:$16 sps:$4 sm:$0xff]   ;;  %v3728_v7 = vld [vmem:[#allocation11 + $0x8] ss:$16 sps:$4 sm:$0xff]  }
  0xde   :  { %1172 = vmatprep.mubr.bf16.mxu0 %v3724_v30  ;;  %1258 = vmatprep.mubr.bf16.mxu1 %v3724_v30  ;;  %v3766_v30 = vld [vmem:[#allocation11 + $0xcc] ss:$16 sps:$4 sm:$0xff]  }
  0xe0   :  { %1143 = vmatpush1.bf16.msra.mxu0 %v3632_v8  ;;  %1229 = vmatpush1.bf16.msra.mxu1 %v3635_v9  ;;  %v3733_v8 = vld [vmem:[#allocation11 + $0x24] ss:$16 sps:$4 sm:$0xff]   ;;  %v3736_v9 = vld [vmem:[#allocation11 + $0x2c] ss:$16 sps:$4 sm:$0xff]  }
  0xe1   :  { %1144 = vmatprep.subr.bf16.mxu0 %v3640_v10  ;;  %1230 = vmatprep.subr.bf16.mxu1 %v3643_v11  ;;  %v3731_v10 = vld [vmem:[#allocation11 + $0x20] ss:$16 sps:$4 sm:$0xff]   ;;  %v3734_v11 = vld [vmem:[#allocation11 + $0x28] ss:$16 sps:$4 sm:$0xff]  }
  0xe4   :  { %1145 = vmatpush1.bf16.msra.mxu0 %v3638_v12  ;;  %1231 = vmatpush1.bf16.msra.mxu1 %v3641_v13  ;;  %v3823_v12 = vld [vmem:[#allocation8 + $0x4] ss:$16 sps:$4 sm:$0xff]  }
  0xe5   :  { %1146 = vmatprep.subr.bf16.mxu0 %v3646_v14  ;;  %1232 = vmatprep.subr.bf16.mxu1 %v3649_v15  ;;  %v3739_v13 = vld [vmem:[#allocation11 + $0x44] ss:$16 sps:$4 sm:$0xff]   ;;  %v3742_v14 = vld [vmem:[#allocation11 + $0x4c] ss:$16 sps:$4 sm:$0xff]   ;;  %v3737_v15 = vld [vmem:[#allocation11 + $0x40] ss:$16 sps:$4 sm:$0xff]  }
  0xe8   :  { %1147 = vmatpush1.bf16.msra.mxu0 %v3644_v16  ;;  %1233 = vmatpush1.bf16.msra.mxu1 %v3647_v17  ;;  %v3740_v16 = vld [vmem:[#allocation11 + $0x48] ss:$16 sps:$4 sm:$0xff]   ;;  %v3745_v17 = vld [vmem:[#allocation11 + $0x64] ss:$16 sps:$4 sm:$0xff]  }
  0xe9   :  { %1148 = vmatprep.subr.bf16.mxu0 %v3652_v18  ;;  %1234 = vmatprep.subr.bf16.mxu1 %v3655_v19  ;;  %v3748_v18 = vld [vmem:[#allocation11 + $0x6c] ss:$16 sps:$4 sm:$0xff]   ;;  %v3743_v19 = vld [vmem:[#allocation11 + $0x60] ss:$16 sps:$4 sm:$0xff]  }
  0xec   :  { %1149 = vmatpush1.bf16.msra.mxu0 %v3650_v20  ;;  %1235 = vmatpush1.bf16.msra.mxu1 %v3653_v21  ;;  %v3746_v20 = vld [vmem:[#allocation11 + $0x68] ss:$16 sps:$4 sm:$0xff]   ;;  %v3751_v21 = vld [vmem:[#allocation11 + $0x84] ss:$16 sps:$4 sm:$0xff]  }
  0xed   :  { %1150 = vmatprep.subr.bf16.mxu0 %v3658_v22  ;;  %1236 = vmatprep.subr.bf16.mxu1 %v3661_v23  ;;  %v3754_v22 = vld [vmem:[#allocation11 + $0x8c] ss:$16 sps:$4 sm:$0xff]   ;;  %v3749_v23 = vld [vmem:[#allocation11 + $0x80] ss:$16 sps:$4 sm:$0xff]  }
  0xf0   :  { %1151 = vmatpush1.bf16.msra.mxu0 %v3656_v24  ;;  %1237 = vmatpush1.bf16.msra.mxu1 %v3659_v25  ;;  %v3752_v24 = vld [vmem:[#allocation11 + $0x88] ss:$16 sps:$4 sm:$0xff]   ;;  %v3757_v25 = vld [vmem:[#allocation11 + $0xa4] ss:$16 sps:$4 sm:$0xff]  }
  0xf1   :  { %1152 = vmatprep.subr.bf16.mxu0 %v3664_v26  ;;  %1238 = vmatprep.subr.bf16.mxu1 %v3667_v27  ;;  %v3760_v26 = vld [vmem:[#allocation11 + $0xac] ss:$16 sps:$4 sm:$0xff]   ;;  %v3755_v27 = vld [vmem:[#allocation11 + $0xa0] ss:$16 sps:$4 sm:$0xff]  }
  0xf4   :  { %1153 = vmatpush1.bf16.msra.mxu0 %v3662_v28  ;;  %1239 = vmatpush1.bf16.msra.mxu1 %v3665_v29  ;;  %v3758_v28 = vld [vmem:[#allocation11 + $0xa8] ss:$16 sps:$4 sm:$0xff]   ;;  %v3763_v29 = vld [vmem:[#allocation11 + $0xc4] ss:$16 sps:$4 sm:$0xff]  }
  0xf5   :  { %1154 = vmatprep.subr.bf16.mxu0 %v3670_v31  ;;  %1240 = vmatprep.subr.bf16.mxu1 %v3673_v32  ;;  %v3761_v31 = vld [vmem:[#allocation11 + $0xc0] ss:$16 sps:$4 sm:$0xff]   ;;  %v3764_v32 = vld [vmem:[#allocation11 + $0xc8] ss:$16 sps:$4 sm:$0xff]  }
  0xf8   :  { %1155 = vmatpush1.bf16.msra.mxu0 %v3668_v33  ;;  %1241 = vmatpush1.bf16.msra.mxu1 %v3671_v34  ;;  %v3769_v33 = vld [vmem:[#allocation11 + $0xe4] ss:$16 sps:$4 sm:$0xff]   ;;  %v3772_v34 = vld [vmem:[#allocation11 + $0xec] ss:$16 sps:$4 sm:$0xff]  }
  0xf9   :  { %1156 = vmatprep.subr.bf16.mxu0 %v3676_v35  ;;  %1242 = vmatprep.subr.bf16.mxu1 %v3679_v36  ;;  %v3767_v35 = vld [vmem:[#allocation11 + $0xe0] ss:$16 sps:$4 sm:$0xff]   ;;  %v3770_v36 = vld [vmem:[#allocation11 + $0xe8] ss:$16 sps:$4 sm:$0xff]  }
  0xfc   :  { %1157 = vmatpush1.bf16.msra.mxu0 %v3674_v37  ;;  %1243 = vmatpush1.bf16.msra.mxu1 %v3677_v38  ;;  %v3775_v37 = vld [vmem:[#allocation11 + $0x104] ss:$16 sps:$4 sm:$0xff]   ;;  %v3778_v38 = vld [vmem:[#allocation11 + $0x10c] ss:$16 sps:$4 sm:$0xff]  }
  0xfd   :  { %1158 = vmatprep.subr.bf16.mxu0 %v3682_v39  ;;  %1244 = vmatprep.subr.bf16.mxu1 %v3685_v40  ;;  %v3773_v39 = vld [vmem:[#allocation11 + $0x100] ss:$16 sps:$4 sm:$0xff]   ;;  %v3776_v40 = vld [vmem:[#allocation11 + $0x108] ss:$16 sps:$4 sm:$0xff]  }
 0x100   :  { %1159 = vmatpush1.bf16.msra.mxu0 %v3680_v41  ;;  %1245 = vmatpush1.bf16.msra.mxu1 %v3683_v42  ;;  %v3781_v41 = vld [vmem:[#allocation11 + $0x124] ss:$16 sps:$4 sm:$0xff]   ;;  %v3784_v42 = vld [vmem:[#allocation11 + $0x12c] ss:$16 sps:$4 sm:$0xff]  }
 0x101   :  { %1160 = vmatprep.subr.bf16.mxu0 %v3688_v43  ;;  %1246 = vmatprep.subr.bf16.mxu1 %v3691_v44  ;;  %v3779_v43 = vld [vmem:[#allocation11 + $0x120] ss:$16 sps:$4 sm:$0xff]   ;;  %v3782_v44 = vld [vmem:[#allocation11 + $0x128] ss:$16 sps:$4 sm:$0xff]  }
 0x104   :  { %1161 = vmatpush1.bf16.msra.mxu0 %v3686_v45  ;;  %1247 = vmatpush1.bf16.msra.mxu1 %v3689_v46  ;;  %v3787_v45 = vld [vmem:[#allocation11 + $0x144] ss:$16 sps:$4 sm:$0xff]   ;;  %v3790_v46 = vld [vmem:[#allocation11 + $0x14c] ss:$16 sps:$4 sm:$0xff]  }
 0x105   :  { %1162 = vmatprep.subr.bf16.mxu0 %v3694_v47  ;;  %1248 = vmatprep.subr.bf16.mxu1 %v3697_v48  ;;  %v3785_v47 = vld [vmem:[#allocation11 + $0x140] ss:$16 sps:$4 sm:$0xff]   ;;  %v3788_v48 = vld [vmem:[#allocation11 + $0x148] ss:$16 sps:$4 sm:$0xff]  }
 0x108   :  { %1163 = vmatpush1.bf16.msra.mxu0 %v3692_v49  ;;  %1249 = vmatpush1.bf16.msra.mxu1 %v3695_v50  ;;  %v3793_v49 = vld [vmem:[#allocation11 + $0x164] ss:$16 sps:$4 sm:$0xff]   ;;  %v3796_v50 = vld [vmem:[#allocation11 + $0x16c] ss:$16 sps:$4 sm:$0xff]  }
 0x109   :  { %1164 = vmatprep.subr.bf16.mxu0 %v3700_v51  ;;  %1250 = vmatprep.subr.bf16.mxu1 %v3703_v52  ;;  %v3791_v51 = vld [vmem:[#allocation11 + $0x160] ss:$16 sps:$4 sm:$0xff]   ;;  %v3794_v52 = vld [vmem:[#allocation11 + $0x168] ss:$16 sps:$4 sm:$0xff]  }
 0x10c   :  { %1165 = vmatpush1.bf16.msra.mxu0 %v3698_v53  ;;  %1251 = vmatpush1.bf16.msra.mxu1 %v3701_v54  ;;  %v3799_v53 = vld [vmem:[#allocation11 + $0x184] ss:$16 sps:$4 sm:$0xff]   ;;  %v3802_v54 = vld [vmem:[#allocation11 + $0x18c] ss:$16 sps:$4 sm:$0xff]  }
 0x10d   :  { %1166 = vmatprep.subr.bf16.mxu0 %v3706_v55  ;;  %1252 = vmatprep.subr.bf16.mxu1 %v3709_v56  ;;  %v3797_v55 = vld [vmem:[#allocation11 + $0x180] ss:$16 sps:$4 sm:$0xff]   ;;  %v3800_v56 = vld [vmem:[#allocation11 + $0x188] ss:$16 sps:$4 sm:$0xff]  }
 0x110   :  { %1167 = vmatpush1.bf16.msra.mxu0 %v3704_v57  ;;  %1253 = vmatpush1.bf16.msra.mxu1 %v3707_v58  ;;  %v3805_v57 = vld [vmem:[#allocation11 + $0x1a4] ss:$16 sps:$4 sm:$0xff]   ;;  %v3808_v58 = vld [vmem:[#allocation11 + $0x1ac] ss:$16 sps:$4 sm:$0xff]  }
 0x111   :  { %1168 = vmatprep.subr.bf16.mxu0 %v3712_v59  ;;  %1254 = vmatprep.subr.bf16.mxu1 %v3715_v60  ;;  %v3803_v59 = vld [vmem:[#allocation11 + $0x1a0] ss:$16 sps:$4 sm:$0xff]   ;;  %v3806_v60 = vld [vmem:[#allocation11 + $0x1a8] ss:$16 sps:$4 sm:$0xff]  }
 0x114   :  { %1169 = vmatpush1.bf16.msra.mxu0 %v3710_v61  ;;  %1255 = vmatpush1.bf16.msra.mxu1 %v3713_v62  ;;  %v3811_v61 = vld [vmem:[#allocation11 + $0x1c4] ss:$16 sps:$4 sm:$0xff]   ;;  %v3814_v62 = vld [vmem:[#allocation11 + $0x1cc] ss:$16 sps:$4 sm:$0xff]  }
 0x115   :  { %1170 = vmatprep.subr.bf16.mxu0 %v3718_v63  ;;  %1256 = vmatprep.subr.bf16.mxu1 %v3721_v0  ;;  %v3809_v63 = vld [vmem:[#allocation11 + $0x1c0] ss:$16 sps:$4 sm:$0xff]   ;;  %v3812_v0 = vld [vmem:[#allocation11 + $0x1c8] ss:$16 sps:$4 sm:$0xff]  }
 0x118   :  { %1171 = vmatpush1.bf16.msra.mxu0 %v3716_v1  ;;  %1257 = vmatpush1.bf16.msra.mxu1 %v3719_v2  ;;  %v3817_v1 = vld [vmem:[#allocation11 + $0x1e4] ss:$16 sps:$4 sm:$0xff]   ;;  %v3820_v2 = vld [vmem:[#allocation11 + $0x1ec] ss:$16 sps:$4 sm:$0xff]  }
 0x119   :  { %1929 = vmatprep.subr.bf16.mxu0 %v3727_v3  ;;  %2015 = vmatprep.subr.bf16.mxu1 %v3730_v4  ;;  %v3815_v3 = vld [vmem:[#allocation11 + $0x1e0] ss:$16 sps:$4 sm:$0xff]   ;;  %v3818_v4 = vld [vmem:[#allocation11 + $0x1e8] ss:$16 sps:$4 sm:$0xff]  }
 0x11b   :  { %1173 = vmatmul.mubr.bf16.vlgmr.msra.gmra.mrb[0].mxu0 %v3722_v5  ;;  %1259 = vmatmul.mubr.bf16.vlgmr.msra.gmra.mrb[0].mxu1 %v3722_v5  ;;  %v3826_v5 = vld [vmem:[#allocation11 + $0x204] ss:$16 sps:$4 sm:$0xff]  }
 0x11c   :  { %1930 = vmatpush1.bf16.msra.mxu0 %v3725_v6  ;;  %2016 = vmatpush1.bf16.msra.mxu1 %v3728_v7  ;;  %v3829_v6 = vld [vmem:[#allocation11 + $0x20c] ss:$16 sps:$4 sm:$0xff]   ;;  %v3821_v7 = vld [vmem:[#allocation8] ss:$16 sps:$4 sm:$0xff]  }
 0x11d   :  { %1931 = vmatprep.subr.bf16.mxu0 %v3733_v8  ;;  %2017 = vmatprep.subr.bf16.mxu1 %v3736_v9  ;;  %v3824_v8 = vld [vmem:[#allocation11 + $0x200] ss:$16 sps:$4 sm:$0xff]   ;;  %v3827_v9 = vld [vmem:[#allocation11 + $0x208] ss:$16 sps:$4 sm:$0xff]  }
 0x11e   :  { %1961 = vmatprep.mubr.bf16.mxu0 %v3823_v12  ;;  %2047 = vmatprep.mubr.bf16.mxu1 %v3823_v12  ;;  %v3830_v12 = vld [vmem:[#allocation11 + $0x220] ss:$16 sps:$4 sm:$0xff]  }
 0x120   :  { %1932 = vmatpush1.bf16.msra.mxu0 %v3731_v10  ;;  %2018 = vmatpush1.bf16.msra.mxu1 %v3734_v11  ;;  %v3832_v10 = vld [vmem:[#allocation11 + $0x224] ss:$16 sps:$4 sm:$0xff]   ;;  %v3835_v11 = vld [vmem:[#allocation11 + $0x22c] ss:$16 sps:$4 sm:$0xff]  }
 0x121   :  { %1933 = vmatprep.subr.bf16.mxu0 %v3739_v13  ;;  %2019 = vmatprep.subr.bf16.mxu1 %v3742_v14  ;;  %v3833_v13 = vld [vmem:[#allocation11 + $0x228] ss:$16 sps:$4 sm:$0xff]   ;;  %v3922_v14 = vld [vmem:[#allocation8 + $0xc] ss:$16 sps:$4 sm:$0xff]  }
 0x124   :  { %1934 = vmatpush1.bf16.msra.mxu0 %v3737_v15  ;;  %2020 = vmatpush1.bf16.msra.mxu1 %v3740_v16  ;;  %v3838_v15 = vld [vmem:[#allocation11 + $0x244] ss:$16 sps:$4 sm:$0xff]   ;;  %v3841_v16 = vld [vmem:[#allocation11 + $0x24c] ss:$16 sps:$4 sm:$0xff]  }
 0x125   :  { %1935 = vmatprep.subr.bf16.mxu0 %v3745_v17  ;;  %2021 = vmatprep.subr.bf16.mxu1 %v3748_v18  ;;  %v3836_v17 = vld [vmem:[#allocation11 + $0x240] ss:$16 sps:$4 sm:$0xff]   ;;  %v3839_v18 = vld [vmem:[#allocation11 + $0x248] ss:$16 sps:$4 sm:$0xff]  }
 0x128   :  { %1936 = vmatpush1.bf16.msra.mxu0 %v3743_v19  ;;  %2022 = vmatpush1.bf16.msra.mxu1 %v3746_v20  ;;  %v3844_v19 = vld [vmem:[#allocation11 + $0x264] ss:$16 sps:$4 sm:$0xff]   ;;  %v3847_v20 = vld [vmem:[#allocation11 + $0x26c] ss:$16 sps:$4 sm:$0xff]  }
 0x129   :  { %1937 = vmatprep.subr.bf16.mxu0 %v3751_v21  ;;  %2023 = vmatprep.subr.bf16.mxu1 %v3754_v22  ;;  %v3842_v21 = vld [vmem:[#allocation11 + $0x260] ss:$16 sps:$4 sm:$0xff]   ;;  %v3845_v22 = vld [vmem:[#allocation11 + $0x268] ss:$16 sps:$4 sm:$0xff]  }
 0x12c   :  { %1938 = vmatpush1.bf16.msra.mxu0 %v3749_v23  ;;  %2024 = vmatpush1.bf16.msra.mxu1 %v3752_v24  ;;  %v3850_v23 = vld [vmem:[#allocation11 + $0x284] ss:$16 sps:$4 sm:$0xff]   ;;  %v3853_v24 = vld [vmem:[#allocation11 + $0x28c] ss:$16 sps:$4 sm:$0xff]  }
 0x12d   :  { %1939 = vmatprep.subr.bf16.mxu0 %v3757_v25  ;;  %2025 = vmatprep.subr.bf16.mxu1 %v3760_v26  ;;  %v3848_v25 = vld [vmem:[#allocation11 + $0x280] ss:$16 sps:$4 sm:$0xff]   ;;  %v3851_v26 = vld [vmem:[#allocation11 + $0x288] ss:$16 sps:$4 sm:$0xff]  }
 0x130   :  { %1940 = vmatpush1.bf16.msra.mxu0 %v3755_v27  ;;  %2026 = vmatpush1.bf16.msra.mxu1 %v3758_v28  ;;  %v3856_v27 = vld [vmem:[#allocation11 + $0x2a4] ss:$16 sps:$4 sm:$0xff]   ;;  %v3859_v28 = vld [vmem:[#allocation11 + $0x2ac] ss:$16 sps:$4 sm:$0xff]  }
 0x131   :  { %1941 = vmatprep.subr.bf16.mxu0 %v3763_v29  ;;  %2027 = vmatprep.subr.bf16.mxu1 %v3766_v30  ;;  %v3854_v29 = vld [vmem:[#allocation11 + $0x2a0] ss:$16 sps:$4 sm:$0xff]   ;;  %v3857_v30 = vld [vmem:[#allocation11 + $0x2a8] ss:$16 sps:$4 sm:$0xff]  }
 0x134   :  { %1942 = vmatpush1.bf16.msra.mxu0 %v3761_v31  ;;  %2028 = vmatpush1.bf16.msra.mxu1 %v3764_v32  ;;  %v3862_v31 = vld [vmem:[#allocation11 + $0x2c4] ss:$16 sps:$4 sm:$0xff]   ;;  %v3865_v32 = vld [vmem:[#allocation11 + $0x2cc] ss:$16 sps:$4 sm:$0xff]  }
 0x135   :  { %1943 = vmatprep.subr.bf16.mxu0 %v3769_v33  ;;  %2029 = vmatprep.subr.bf16.mxu1 %v3772_v34  ;;  %v3860_v33 = vld [vmem:[#allocation11 + $0x2c0] ss:$16 sps:$4 sm:$0xff]   ;;  %v3863_v34 = vld [vmem:[#allocation11 + $0x2c8] ss:$16 sps:$4 sm:$0xff]  }
 0x138   :  { %1944 = vmatpush1.bf16.msra.mxu0 %v3767_v35  ;;  %2030 = vmatpush1.bf16.msra.mxu1 %v3770_v36  ;;  %v3868_v35 = vld [vmem:[#allocation11 + $0x2e4] ss:$16 sps:$4 sm:$0xff]   ;;  %v3871_v36 = vld [vmem:[#allocation11 + $0x2ec] ss:$16 sps:$4 sm:$0xff]  }
 0x139   :  { %1945 = vmatprep.subr.bf16.mxu0 %v3775_v37  ;;  %2031 = vmatprep.subr.bf16.mxu1 %v3778_v38  ;;  %v3866_v37 = vld [vmem:[#allocation11 + $0x2e0] ss:$16 sps:$4 sm:$0xff]   ;;  %v3869_v38 = vld [vmem:[#allocation11 + $0x2e8] ss:$16 sps:$4 sm:$0xff]  }
 0x13c   :  { %1946 = vmatpush1.bf16.msra.mxu0 %v3773_v39  ;;  %2032 = vmatpush1.bf16.msra.mxu1 %v3776_v40  ;;  %v3874_v39 = vld [vmem:[#allocation11 + $0x304] ss:$16 sps:$4 sm:$0xff]   ;;  %v3877_v40 = vld [vmem:[#allocation11 + $0x30c] ss:$16 sps:$4 sm:$0xff]  }
 0x13d   :  { %1947 = vmatprep.subr.bf16.mxu0 %v3781_v41  ;;  %2033 = vmatprep.subr.bf16.mxu1 %v3784_v42  ;;  %v3872_v41 = vld [vmem:[#allocation11 + $0x300] ss:$16 sps:$4 sm:$0xff]   ;;  %v3875_v42 = vld [vmem:[#allocation11 + $0x308] ss:$16 sps:$4 sm:$0xff]  }
 0x140   :  { %1948 = vmatpush1.bf16.msra.mxu0 %v3779_v43  ;;  %2034 = vmatpush1.bf16.msra.mxu1 %v3782_v44  ;;  %v3880_v43 = vld [vmem:[#allocation11 + $0x324] ss:$16 sps:$4 sm:$0xff]   ;;  %v3883_v44 = vld [vmem:[#allocation11 + $0x32c] ss:$16 sps:$4 sm:$0xff]  }
 0x141   :  { %1949 = vmatprep.subr.bf16.mxu0 %v3787_v45  ;;  %2035 = vmatprep.subr.bf16.mxu1 %v3790_v46  ;;  %v3878_v45 = vld [vmem:[#allocation11 + $0x320] ss:$16 sps:$4 sm:$0xff]   ;;  %v3881_v46 = vld [vmem:[#allocation11 + $0x328] ss:$16 sps:$4 sm:$0xff]  }
 0x144   :  { %1950 = vmatpush1.bf16.msra.mxu0 %v3785_v47  ;;  %2036 = vmatpush1.bf16.msra.mxu1 %v3788_v48  ;;  %v3886_v47 = vld [vmem:[#allocation11 + $0x344] ss:$16 sps:$4 sm:$0xff]   ;;  %v3889_v48 = vld [vmem:[#allocation11 + $0x34c] ss:$16 sps:$4 sm:$0xff]  }
 0x145   :  { %1951 = vmatprep.subr.bf16.mxu0 %v3793_v49  ;;  %2037 = vmatprep.subr.bf16.mxu1 %v3796_v50  ;;  %v3884_v49 = vld [vmem:[#allocation11 + $0x340] ss:$16 sps:$4 sm:$0xff]   ;;  %v3887_v50 = vld [vmem:[#allocation11 + $0x348] ss:$16 sps:$4 sm:$0xff]  }
 0x148   :  { %1952 = vmatpush1.bf16.msra.mxu0 %v3791_v51  ;;  %2038 = vmatpush1.bf16.msra.mxu1 %v3794_v52  ;;  %v3892_v51 = vld [vmem:[#allocation11 + $0x364] ss:$16 sps:$4 sm:$0xff]   ;;  %v3895_v52 = vld [vmem:[#allocation11 + $0x36c] ss:$16 sps:$4 sm:$0xff]  }
 0x149   :  { %1953 = vmatprep.subr.bf16.mxu0 %v3799_v53  ;;  %2039 = vmatprep.subr.bf16.mxu1 %v3802_v54  ;;  %v3890_v53 = vld [vmem:[#allocation11 + $0x360] ss:$16 sps:$4 sm:$0xff]   ;;  %v3893_v54 = vld [vmem:[#allocation11 + $0x368] ss:$16 sps:$4 sm:$0xff]  }
 0x14c   :  { %1954 = vmatpush1.bf16.msra.mxu0 %v3797_v55  ;;  %2040 = vmatpush1.bf16.msra.mxu1 %v3800_v56  ;;  %v3898_v55 = vld [vmem:[#allocation11 + $0x384] ss:$16 sps:$4 sm:$0xff]   ;;  %v3901_v56 = vld [vmem:[#allocation11 + $0x38c] ss:$16 sps:$4 sm:$0xff]  }
 0x14d   :  { %1955 = vmatprep.subr.bf16.mxu0 %v3805_v57  ;;  %2041 = vmatprep.subr.bf16.mxu1 %v3808_v58  ;;  %v3896_v57 = vld [vmem:[#allocation11 + $0x380] ss:$16 sps:$4 sm:$0xff]   ;;  %v3899_v58 = vld [vmem:[#allocation11 + $0x388] ss:$16 sps:$4 sm:$0xff]  }
 0x150   :  { %1956 = vmatpush1.bf16.msra.mxu0 %v3803_v59  ;;  %2042 = vmatpush1.bf16.msra.mxu1 %v3806_v60  ;;  %v3904_v59 = vld [vmem:[#allocation11 + $0x3a4] ss:$16 sps:$4 sm:$0xff]   ;;  %v3907_v60 = vld [vmem:[#allocation11 + $0x3ac] ss:$16 sps:$4 sm:$0xff]  }
 0x151   :  { %1957 = vmatprep.subr.bf16.mxu0 %v3811_v61  ;;  %2043 = vmatprep.subr.bf16.mxu1 %v3814_v62  ;;  %v3902_v61 = vld [vmem:[#allocation11 + $0x3a0] ss:$16 sps:$4 sm:$0xff]   ;;  %v3905_v62 = vld [vmem:[#allocation11 + $0x3a8] ss:$16 sps:$4 sm:$0xff]  }
 0x154   :  { %1958 = vmatpush1.bf16.msra.mxu0 %v3809_v63  ;;  %2044 = vmatpush1.bf16.msra.mxu1 %v3812_v0  ;;  %v3910_v63 = vld [vmem:[#allocation11 + $0x3c4] ss:$16 sps:$4 sm:$0xff]   ;;  %v3913_v0 = vld [vmem:[#allocation11 + $0x3cc] ss:$16 sps:$4 sm:$0xff]  }
 0x155   :  { %1959 = vmatprep.subr.bf16.mxu0 %v3817_v1  ;;  %2045 = vmatprep.subr.bf16.mxu1 %v3820_v2  ;;  %v3908_v1 = vld [vmem:[#allocation11 + $0x3c0] ss:$16 sps:$4 sm:$0xff]   ;;  %v3911_v2 = vld [vmem:[#allocation11 + $0x3c8] ss:$16 sps:$4 sm:$0xff]  }
 0x158   :  { %1960 = vmatpush1.bf16.msra.mxu0 %v3815_v3  ;;  %2046 = vmatpush1.bf16.msra.mxu1 %v3818_v4  ;;  %v3916_v3 = vld [vmem:[#allocation11 + $0x3e4] ss:$16 sps:$4 sm:$0xff]   ;;  %v3919_v4 = vld [vmem:[#allocation11 + $0x3ec] ss:$16 sps:$4 sm:$0xff]  }
 0x159   :  { %1972 = vmatprep.subr.bf16.mxu0 %v3826_v5  ;;  %2058 = vmatprep.subr.bf16.mxu1 %v3829_v6  ;;  %v3914_v5 = vld [vmem:[#allocation11 + $0x3e0] ss:$16 sps:$4 sm:$0xff]   ;;  %v3917_v6 = vld [vmem:[#allocation11 + $0x3e8] ss:$16 sps:$4 sm:$0xff]  }
 0x15b   :  { %1962 = vmatmul.mubr.bf16.vlgmr.msra.gmra.mrb[0].mxu0 %v3821_v7  ;;  %2048 = vmatmul.mubr.bf16.vlgmr.msra.gmra.mrb[0].mxu1 %v3821_v7  ;;  %v3925_v7 = vld [vmem:[#allocation14 + $0x4] ss:$8 sps:$4 sm:$0xff]  }
 0x15c   :  { %1973 = vmatpush1.bf16.msra.mxu0 %v3824_v8  ;;  %2059 = vmatpush1.bf16.msra.mxu1 %v3827_v9  ;;  %v3920_v8 = vld [vmem:[#allocation8 + $0x8] ss:$16 sps:$4 sm:$0xff]  }
 0x15d   :  { %1974 = vmatprep.subr.bf16.mxu0 %v3832_v10  ;;  %2060 = vmatprep.subr.bf16.mxu1 %v3835_v11  ;;  %v3923_v9 = vld [vmem:[#allocation14] ss:$8 sps:$4 sm:$0xff]   ;;  %v3928_v10 = vld [vmem:[#allocation14 + $0x14] ss:$8 sps:$4 sm:$0xff]   ;;  %v3926_v11 = vld [vmem:[#allocation14 + $0x10] ss:$8 sps:$4 sm:$0xff]  }
 0x15e   :  { %2004 = vmatprep.mubr.bf16.mxu0 %v3922_v14  ;;  %2090 = vmatprep.mubr.bf16.mxu1 %v3922_v14  ;;  %v3934_v14 = vld [vmem:[#allocation14 + $0x34] ss:$8 sps:$4 sm:$0xff]  }
 0x160   :  { %1975 = vmatpush1.bf16.msra.mxu0 %v3830_v12  ;;  %2061 = vmatpush1.bf16.msra.mxu1 %v3833_v13  ;;  %v3931_v12 = vld [vmem:[#allocation14 + $0x24] ss:$8 sps:$4 sm:$0xff]   ;;  %v3929_v13 = vld [vmem:[#allocation14 + $0x20] ss:$8 sps:$4 sm:$0xff]  }
 0x161   :  { %1976 = vmatprep.subr.bf16.mxu0 %v3838_v15  ;;  %2062 = vmatprep.subr.bf16.mxu1 %v3841_v16  ;;  %v3932_v15 = vld [vmem:[#allocation14 + $0x30] ss:$8 sps:$4 sm:$0xff]   ;;  %v3937_v16 = vld [vmem:[#allocation14 + $0x44] ss:$8 sps:$4 sm:$0xff]  }
 0x164   :  { %1977 = vmatpush1.bf16.msra.mxu0 %v3836_v17  ;;  %2063 = vmatpush1.bf16.msra.mxu1 %v3839_v18  ;;  %v3935_v17 = vld [vmem:[#allocation14 + $0x40] ss:$8 sps:$4 sm:$0xff]   ;;  %v3940_v18 = vld [vmem:[#allocation14 + $0x54] ss:$8 sps:$4 sm:$0xff]  }
 0x165   :  { %1978 = vmatprep.subr.bf16.mxu0 %v3844_v19  ;;  %2064 = vmatprep.subr.bf16.mxu1 %v3847_v20  ;;  %v3938_v19 = vld [vmem:[#allocation14 + $0x50] ss:$8 sps:$4 sm:$0xff]   ;;  %v3943_v20 = vld [vmem:[#allocation14 + $0x64] ss:$8 sps:$4 sm:$0xff]  }
 0x168   :  { %1979 = vmatpush1.bf16.msra.mxu0 %v3842_v21  ;;  %2065 = vmatpush1.bf16.msra.mxu1 %v3845_v22  ;;  %v3941_v21 = vld [vmem:[#allocation14 + $0x60] ss:$8 sps:$4 sm:$0xff]   ;;  %v3946_v22 = vld [vmem:[#allocation14 + $0x74] ss:$8 sps:$4 sm:$0xff]  }
 0x169   :  { %1980 = vmatprep.subr.bf16.mxu0 %v3850_v23  ;;  %2066 = vmatprep.subr.bf16.mxu1 %v3853_v24  ;;  %v3944_v23 = vld [vmem:[#allocation14 + $0x70] ss:$8 sps:$4 sm:$0xff]   ;;  %v3949_v24 = vld [vmem:[#allocation14 + $0x84] ss:$8 sps:$4 sm:$0xff]  }
 0x16c   :  { %1981 = vmatpush1.bf16.msra.mxu0 %v3848_v25  ;;  %2067 = vmatpush1.bf16.msra.mxu1 %v3851_v26  ;;  %v3947_v25 = vld [vmem:[#allocation14 + $0x80] ss:$8 sps:$4 sm:$0xff]   ;;  %v3952_v26 = vld [vmem:[#allocation14 + $0x94] ss:$8 sps:$4 sm:$0xff]  }
 0x16d   :  { %1982 = vmatprep.subr.bf16.mxu0 %v3856_v27  ;;  %2068 = vmatprep.subr.bf16.mxu1 %v3859_v28  ;;  %v3950_v27 = vld [vmem:[#allocation14 + $0x90] ss:$8 sps:$4 sm:$0xff]   ;;  %v3955_v28 = vld [vmem:[#allocation14 + $0xa4] ss:$8 sps:$4 sm:$0xff]  }
 0x170   :  { %1983 = vmatpush1.bf16.msra.mxu0 %v3854_v29  ;;  %2069 = vmatpush1.bf16.msra.mxu1 %v3857_v30  ;;  %v3953_v29 = vld [vmem:[#allocation14 + $0xa0] ss:$8 sps:$4 sm:$0xff]   ;;  %v3958_v30 = vld [vmem:[#allocation14 + $0xb4] ss:$8 sps:$4 sm:$0xff]  }
 0x171   :  { %1984 = vmatprep.subr.bf16.mxu0 %v3862_v31  ;;  %2070 = vmatprep.subr.bf16.mxu1 %v3865_v32  ;;  %v3956_v31 = vld [vmem:[#allocation14 + $0xb0] ss:$8 sps:$4 sm:$0xff]   ;;  %v3961_v32 = vld [vmem:[#allocation14 + $0xc4] ss:$8 sps:$4 sm:$0xff]  }
 0x174   :  { %1985 = vmatpush1.bf16.msra.mxu0 %v3860_v33  ;;  %2071 = vmatpush1.bf16.msra.mxu1 %v3863_v34  ;;  %v3959_v33 = vld [vmem:[#allocation14 + $0xc0] ss:$8 sps:$4 sm:$0xff]   ;;  %v3964_v34 = vld [vmem:[#allocation14 + $0xd4] ss:$8 sps:$4 sm:$0xff]  }
 0x175   :  { %1986 = vmatprep.subr.bf16.mxu0 %v3868_v35  ;;  %2072 = vmatprep.subr.bf16.mxu1 %v3871_v36  ;;  %v3962_v35 = vld [vmem:[#allocation14 + $0xd0] ss:$8 sps:$4 sm:$0xff]   ;;  %v2103_v36 = vlaneseq }
 0x178   :  { %1987 = vmatpush1.bf16.msra.mxu0 %v3866_v37  ;;  %2073 = vmatpush1.bf16.msra.mxu1 %v3869_v38  ;;  %v4469_v37 = vshrl.u32 %v2103_v36, 7  ;;  %v3988_v36 = vld [vmem:[#allocation14 + $0x154] ss:$8 sps:$4 sm:$0xff]  }
 0x179   :  { %1988 = vmatprep.subr.bf16.mxu0 %v3874_v39  ;;  %2074 = vmatprep.subr.bf16.mxu1 %v3877_v40  ;;  %v2101_v39 = vld [vmem:[%s4614_s6] sm:$0xf] }
 0x17a   :  { %v2113_v38 = vsub.s32 2, %v4469_v37 }
 0x17c   :  { %1989 = vmatpush1.bf16.msra.mxu0 %v3872_v41  ;;  %2075 = vmatpush1.bf16.msra.mxu1 %v3875_v42  ;;  %v2114_v40 = vrot.slane %v2101_v39, %v2113_v38  ;;  %v3967_v41 = vld [vmem:[#allocation14 + $0xe4] ss:$8 sps:$4 sm:$0xff]   ;;  %v3965_v42 = vld [vmem:[#allocation14 + $0xe0] ss:$8 sps:$4 sm:$0xff]   ;;  %v3986_v38 = vld [vmem:[#allocation14 + $0x150] ss:$8 sps:$4 sm:$0xff]  }
 0x17d   :  { %1990 = vmatprep.subr.bf16.mxu0 %v3880_v43  ;;  %2076 = vmatprep.subr.bf16.mxu1 %v3883_v44  ;;  %v3970_v43 = vld [vmem:[#allocation14 + $0xf4] ss:$8 sps:$4 sm:$0xff]   ;;  %v3968_v44 = vld [vmem:[#allocation14 + $0xf0] ss:$8 sps:$4 sm:$0xff]  }
 0x180   :  { %1991 = vmatpush1.bf16.msra.mxu0 %v3878_v45  ;;  %2077 = vmatpush1.bf16.msra.mxu1 %v3881_v46  ;;  %v3973_v45 = vld [vmem:[#allocation14 + $0x104] ss:$8 sps:$4 sm:$0xff]   ;;  %v4019_v46 = vld [vmem:[%s4617_s9 + $0x40] sm:$0xff]  }
 0x181   :  { %1992 = vmatprep.subr.bf16.mxu0 %v3886_v47  ;;  %2078 = vmatprep.subr.bf16.mxu1 %v3889_v48  ;;  %v4020_v47 = vld [vmem:[%s4617_s9] sm:$0xff]   ;;  %v4021_v48 = vld [vmem:[%s4617_s9 + $0x48] sm:$0xff]  }
 0x184   :  { %1993 = vmatpush1.bf16.msra.mxu0 %v3884_v49  ;;  %2079 = vmatpush1.bf16.msra.mxu1 %v3887_v50  ;;  %v4022_v49 = vld [vmem:[%s4617_s9 + $0x8] sm:$0xff]   ;;  %v4023_v50 = vld [vmem:[%s4617_s9 + $0x50] sm:$0xff]  }
 0x185   :  { %1994 = vmatprep.subr.bf16.mxu0 %v3892_v51  ;;  %2080 = vmatprep.subr.bf16.mxu1 %v3895_v52  ;;  %v4024_v51 = vld [vmem:[%s4617_s9 + $0x10] sm:$0xff]   ;;  %v4025_v52 = vld [vmem:[%s4617_s9 + $0x58] sm:$0xff]  }
 0x188   :  { %1995 = vmatpush1.bf16.msra.mxu0 %v3890_v53  ;;  %2081 = vmatpush1.bf16.msra.mxu1 %v3893_v54  ;;  %v4026_v53 = vld [vmem:[%s4617_s9 + $0x18] sm:$0xff]   ;;  %v4027_v54 = vld [vmem:[%s4617_s9 + $0x60] sm:$0xff]  }
 0x189   :  { %1996 = vmatprep.subr.bf16.mxu0 %v3898_v55  ;;  %2082 = vmatprep.subr.bf16.mxu1 %v3901_v56  ;;  %v4028_v55 = vld [vmem:[%s4617_s9 + $0x20] sm:$0xff]   ;;  %v4029_v56 = vld [vmem:[%s4617_s9 + $0x68] sm:$0xff]  }
 0x18c   :  { %1997 = vmatpush1.bf16.msra.mxu0 %v3896_v57  ;;  %2083 = vmatpush1.bf16.msra.mxu1 %v3899_v58  ;;  %v2105_v57 = vsub.s32 0, %v4469_v37  ;;  %v2109_v58 = vsub.s32 1, %v4469_v37 }
 0x18d   :  { %1998 = vmatprep.subr.bf16.mxu0 %v3904_v59  ;;  %2084 = vmatprep.subr.bf16.mxu1 %v3907_v60  ;;  %v2117_v59 = vsub.s32 3, %v4469_v37  ;;  %v4036_v37 = vld [vmem:[%s4619_s11 + $0x8] sm:$0xff]  }
 0x18e   :  { %v2106_v60 = vrot.slane %v2101_v39, %v2105_v57 }
 0x190   :  { %1999 = vmatpush1.bf16.msra.mxu0 %v3902_v61  ;;  %2085 = vmatpush1.bf16.msra.mxu1 %v3905_v62  ;;  %v2110_v61 = vrot.slane %v2101_v39, %v2109_v58  ;;  %v2118_v62 = vrot.slane %v2101_v39, %v2117_v59  ;;  %v3991_v39 = vld [vmem:[#allocation14 + $0x164] ss:$8 sps:$4 sm:$0xff]   ;;  %v4018_v59 = vld [vmem:[#allocation14 + $0x1f4] ss:$8 sps:$4 sm:$0xff]  }
 0x191   :  { %2000 = vmatprep.subr.bf16.mxu0 %v3910_v63  ;;  %2086 = vmatprep.subr.bf16.mxu1 %v3913_v0 }
 0x194   :  { %2001 = vmatpush1.bf16.msra.mxu0 %v3908_v1  ;;  %2087 = vmatpush1.bf16.msra.mxu1 %v3911_v2 }
 0x195   :  { %2002 = vmatprep.subr.bf16.mxu0 %v3916_v3  ;;  %2088 = vmatprep.subr.bf16.mxu1 %v3919_v4 }
 0x198   :  { %2003 = vmatpush1.bf16.msra.mxu0 %v3914_v5  ;;  %2089 = vmatpush1.bf16.msra.mxu1 %v3917_v6 }
 0x199   :  { %2539 = vmatprep.subr.bf16.mxu0 %v3925_v7  ;;  %3411 = vmatprep.subr.bf16.mxu1 %v4019_v46  ;;  %v3998_v46 = vld [vmem:[#allocation14 + $0x190] ss:$8 sps:$4 sm:$0xff]  }
 0x19b   :  { %2005 = vmatmul.mubr.bf16.vlgmr.msra.gmra.mrb[0].mxu0 %v3920_v8  ;;  %2091 = vmatmul.mubr.bf16.vlgmr.msra.gmra.mrb[0].mxu1 %v3920_v8 }
 0x19c   :  { %2540 = vmatpush1.bf16.msra.mxu0 %v3923_v9  ;;  %3412 = vmatpush3.bf16.msra.mxu1 %v4020_v47  ;;  %v4003_v47 = vld [vmem:[#allocation14 + $0x1a4] ss:$8 sps:$4 sm:$0xff]  }
 0x19d   :  { %2541 = vmatprep.subr.bf16.mxu0 %v3928_v10  ;;  %3413 = vmatprep.subr.bf16.mxu1 %v4021_v48  ;;  %v4001_v48 = vld [vmem:[#allocation14 + $0x1a0] ss:$8 sps:$4 sm:$0xff]  }
 0x1a0   :  { %2542 = vmatpush1.bf16.msra.mxu0 %v3926_v11  ;;  %3414 = vmatpush3.bf16.msra.mxu1 %v4022_v49  ;;  %v4006_v49 = vld [vmem:[#allocation14 + $0x1b4] ss:$8 sps:$4 sm:$0xff]  }
 0x1a1   :  { %2543 = vmatprep.subr.bf16.mxu0 %v3931_v12  ;;  %3415 = vmatprep.subr.bf16.mxu1 %v4023_v50  ;;  %v4004_v50 = vld [vmem:[#allocation14 + $0x1b0] ss:$8 sps:$4 sm:$0xff]  }
 0x1a4   :  { %2544 = vmatpush1.bf16.msra.mxu0 %v3929_v13  ;;  %3416 = vmatpush3.bf16.msra.mxu1 %v4024_v51  ;;  %v4009_v51 = vld [vmem:[#allocation14 + $0x1c4] ss:$8 sps:$4 sm:$0xff]  }
 0x1a5   :  { %2545 = vmatprep.subr.bf16.mxu0 %v3934_v14  ;;  %3417 = vmatprep.subr.bf16.mxu1 %v4025_v52  ;;  %v4007_v52 = vld [vmem:[#allocation14 + $0x1c0] ss:$8 sps:$4 sm:$0xff]  }
 0x1a8   :  { %2546 = vmatpush1.bf16.msra.mxu0 %v3932_v15  ;;  %3418 = vmatpush3.bf16.msra.mxu1 %v4026_v53  ;;  %v4012_v53 = vld [vmem:[#allocation14 + $0x1d4] ss:$8 sps:$4 sm:$0xff]  }
 0x1a9   :  { %2547 = vmatprep.subr.bf16.mxu0 %v3937_v16  ;;  %3419 = vmatprep.subr.bf16.mxu1 %v4027_v54  ;;  %v4010_v54 = vld [vmem:[#allocation14 + $0x1d0] ss:$8 sps:$4 sm:$0xff]  }
 0x1ac   :  { %2548 = vmatpush1.bf16.msra.mxu0 %v3935_v17  ;;  %3420 = vmatpush3.bf16.msra.mxu1 %v4028_v55  ;;  %v4015_v55 = vld [vmem:[#allocation14 + $0x1e4] ss:$8 sps:$4 sm:$0xff]  }
 0x1ad   :  { %2549 = vmatprep.subr.bf16.mxu0 %v3940_v18  ;;  %3421 = vmatprep.subr.bf16.mxu1 %v4029_v56  ;;  %v4013_v56 = vld [vmem:[#allocation14 + $0x1e0] ss:$8 sps:$4 sm:$0xff]  }
 0x1b0   :  { %2550 = vmatpush1.bf16.msra.mxu0 %v3938_v19 }
 0x1b1   :  { %2551 = vmatprep.subr.bf16.mxu0 %v3943_v20 }
 0x1b4   :  { %2552 = vmatpush1.bf16.msra.mxu0 %v3941_v21 }
 0x1b5   :  { %2553 = vmatprep.subr.bf16.mxu0 %v3946_v22 }
 0x1b8   :  { %2554 = vmatpush1.bf16.msra.mxu0 %v3944_v23 }
 0x1b9   :  { %2555 = vmatprep.subr.bf16.mxu0 %v3949_v24 }
 0x1bc   :  { %2556 = vmatpush1.bf16.msra.mxu0 %v3947_v25 }
 0x1bd   :  { %2557 = vmatprep.subr.bf16.mxu0 %v3952_v26 }
 0x1c0   :  { %2558 = vmatpush1.bf16.msra.mxu0 %v3950_v27  ;;  %v3971_v27 = vld [vmem:[#allocation14 + $0x100] ss:$8 sps:$4 sm:$0xff]  }
 0x1c1   :  { %2559 = vmatprep.subr.bf16.mxu0 %v3955_v28  ;;  %v3976_v28 = vld [vmem:[#allocation14 + $0x114] ss:$8 sps:$4 sm:$0xff]  }
 0x1c4   :  { %2560 = vmatpush1.bf16.msra.mxu0 %v3953_v29  ;;  %v3974_v29 = vld [vmem:[#allocation14 + $0x110] ss:$8 sps:$4 sm:$0xff]  }
 0x1c5   :  { %2561 = vmatprep.subr.bf16.mxu0 %v3958_v30  ;;  %v3979_v30 = vld [vmem:[#allocation14 + $0x124] ss:$8 sps:$4 sm:$0xff]  }
 0x1c8   :  { %2562 = vmatpush1.bf16.msra.mxu0 %v3956_v31  ;;  %v3977_v31 = vld [vmem:[#allocation14 + $0x120] ss:$8 sps:$4 sm:$0xff]  }
 0x1c9   :  { %2563 = vmatprep.subr.bf16.mxu0 %v3961_v32  ;;  %v3982_v32 = vld [vmem:[#allocation14 + $0x134] ss:$8 sps:$4 sm:$0xff]  }
 0x1cc   :  { %2564 = vmatpush1.bf16.msra.mxu0 %v3959_v33  ;;  %v3980_v33 = vld [vmem:[#allocation14 + $0x130] ss:$8 sps:$4 sm:$0xff]  }
 0x1cd   :  { %2565 = vmatprep.subr.bf16.mxu0 %v3964_v34  ;;  %v3985_v34 = vld [vmem:[#allocation14 + $0x144] ss:$8 sps:$4 sm:$0xff]  }
 0x1d0   :  { %2566 = vmatpush1.bf16.msra.mxu0 %v3962_v35  ;;  %v3983_v35 = vld [vmem:[#allocation14 + $0x140] ss:$8 sps:$4 sm:$0xff]  }
 0x1d1   :  { %2567 = vmatprep.subr.bf16.mxu0 %v3967_v41  ;;  %v3994_v41 = vld [vmem:[#allocation14 + $0x174] ss:$8 sps:$4 sm:$0xff]  }
 0x1d4   :  { %2568 = vmatpush1.bf16.msra.mxu0 %v3965_v42  ;;  %v3992_v42 = vld [vmem:[#allocation14 + $0x170] ss:$8 sps:$4 sm:$0xff]  }
 0x1d5   :  { %2569 = vmatprep.subr.bf16.mxu0 %v3970_v43  ;;  %v3997_v43 = vld [vmem:[#allocation14 + $0x184] ss:$8 sps:$4 sm:$0xff]  }
 0x1d8   :  { %2570 = vmatpush1.bf16.msra.mxu0 %v3968_v44  ;;  %v3995_v44 = vld [vmem:[#allocation14 + $0x180] ss:$8 sps:$4 sm:$0xff]  }
 0x1d9   :  { %2582 = vmatprep.subr.bf16.mxu0 %v3973_v45  ;;  %v4000_v45 = vld [vmem:[#allocation14 + $0x194] ss:$8 sps:$4 sm:$0xff]  }
 0x26e   :  { %v2006_v63 = vpop.f32.mrb[0].mxu0  ;;  %v2092_v0 = vpop.f32.mrb[0].mxu1 }
 0x26f   :  { %v2123_v1 = vadd.f32 %v2106_v60, %v2006_v63  ;;  %v2125_v2 = vadd.f32 %v2114_v40, %v2092_v0  ;;  %v2008_v3 = vpop.f32.mrb[1].mxu0  ;;  %v2094_v4 = vpop.f32.mrb[1].mxu1  ;;  %v4032_v63 = vld [vmem:[%s4617_s9 + $0x30] sm:$0xff]   ;;  %v4033_v0 = vld [vmem:[%s4617_s9 + $0x78] sm:$0xff]  }
 0x270   :  { %v2124_v5 = vadd.f32 %v2110_v61, %v2008_v3  ;;  %v2126_v6 = vadd.f32 %v2118_v62, %v2094_v4  ;;  %v2010_v7 = vpop.f32.mrb[2].mxu0  ;;  %v2096_v8 = vpop.f32.mrb[2].mxu1  ;;  %v2207_v3 = vld [vmem:[#allocation15] sm:$0x3] }
 0x271   :  { %v2127_v9 = vadd.f32 %v2106_v60, %v2010_v7  ;;  %v2129_v10 = vadd.f32 %v2114_v40, %v2096_v8  ;;  %v2012_v11 = vpop.f32.mrb[3].mxu0  ;;  %v2098_v12 = vpop.f32.mrb[3].mxu1  ;;  %v2131_v15 = vmax.f32 %v2123_v1, 0.0  ;;  %v2133_v16 = vmax.f32 %v2125_v2, 0.0  ;;  %v3989_v40 = vld [vmem:[#allocation14 + $0x160] ss:$8 sps:$4 sm:$0xff]  }
 0x272   :  { %v2128_v13 = vadd.f32 %v2110_v61, %v2012_v11  ;;  %v2130_v14 = vadd.f32 %v2118_v62, %v2098_v12  ;;  %v2132_v19 = vmax.f32 %v2124_v5, 0.0  ;;  %v2134_v20 = vmax.f32 %v2126_v6, 0.0  ;;  %v4016_v60 = vld [vmem:[#allocation14 + $0x1f0] ss:$8 sps:$4 sm:$0xff]   ;;  %v4031_v62 = vld [vmem:[%s4617_s9 + $0x70] sm:$0xff]   ;;  %v4034_v1 = vld [vmem:[%s4617_s9 + $0x38] sm:$0xff]  }
 0x273   :  { %v2135_v17 = vmax.f32 %v2127_v9, 0.0  ;;  %v2137_v18 = vmax.f32 %v2129_v10, 0.0  ;;  %v4030_v61 = vld [vmem:[%s4617_s9 + $0x28] sm:$0xff]   ;;  %v4267_v2 = vmov 0.0   ;;  %v2212_v4 = vrot.slane %v2207_v3, %v2105_v57  ;;  %v4035_v57 = vld [vmem:[%s4619_s11] sm:$0xff]  }
 0x274   :  { %v2136_v21 = vmax.f32 %v2128_v13, 0.0  ;;  %v2138_v22 = vmax.f32 %v2130_v14, 0.0  ;;  %3422 = vmatpush3.bf16.msra.mxu1 %v4030_v61  ;;  %v2216_v5 = vrot.slane %v2207_v3, %v2109_v58  ;;  %v4037_v58 = vld [vmem:[%s4619_s11 + $0x10] sm:$0xff]  }
 0x275   :  { %v2139_v23 = vpack.c.bf16 %v2135_v17, %v2131_v15  ;;  %v4515_v24 = vpack.c.bf16 %v2137_v18, %v2133_v16  ;;  %3423 = vmatprep.subr.bf16.mxu1 %v4031_v62 }
 0x276   :  { %v2140_v25 = vpack.c.bf16 %v2136_v21, %v2132_v19  ;;  %v2142_v26 = vpack.c.bf16 %v2138_v22, %v2134_v20  ;;  %v4038_v20 = vld [vmem:[%s4619_s11 + $0x18] sm:$0xff]   ;;  %v4039_v21 = vld [vmem:[%s4619_s11 + $0x20] sm:$0xff]   ;;  %v4040_v22 = vld [vmem:[%s4619_s11 + $0x28] sm:$0xff]  }
 0x278   :  { %2571 = vmatprep.mubr.bf16.mxu0 %v2140_v25  ;;  %3424 = vmatpush3.bf16.msra.mxu1 %v4032_v63  ;;  %v2924_v63 = vld [vmem:[%s4621_s13] sm:$0x1]  ;;  %s4219_s13 = scalar_lea.vmem %s3035_s4, 16 }
 0x279   :  { %2572 = vmatmul.mubr.bf16.vlgmr.msra.gmra.mrb[4].mxu0 %v2139_v23  ;;  %3425 = vmatprep.subr.bf16.mxu1 %v4033_v0  ;;  %v4041_v23 = vld [vmem:[%s4619_s11 + $0x30] sm:$0xff]   ;;  %v2925_v0 = vpack.c.bf16 %v2924_v63, %v2924_v63  ;;  %p4220_p8 = scmp.ne.s32.totalorder %s3035_s4, %s4219_s13  ;;  %p4225_p10 = scmp.lt.s32.totalorder %s4223_s22, %s4219_s13 }
 0x27a   :  { %2583 = vmatpush1.bf16.msra.mxu0 %v3971_v27  ;;  %2614 = vmatprep.mubr.bf16.mxu0 %v2142_v26  ;;  %v3375_v26 = vld [vmem:[%s4618_s10] ss:$0 sm:$0xff] }
 0x27b   :  { %2584 = vmatprep.subr.bf16.mxu0 %v3976_v28  ;;  %p4226_p11 = por %p4225_p10, %p4224_p9 }
 0x27c   :  { %3426 = vmatpush3.bf16.msra.mxu1 %v4034_v1 }
 0x27d   :  { %3446 = vmatprep.subr.bf16.mxu1 %v4267_v2  ;;  %p4227_p12 = pnand %p4226_p11, %p4220_p8 }
 0x27e   :  { %2585 = vmatpush1.bf16.msra.mxu0 %v3974_v29 }
 0x27f   :  { %2586 = vmatprep.subr.bf16.mxu0 %v3979_v30 }
 0x282   :  { %2587 = vmatpush1.bf16.msra.mxu0 %v3977_v31 }
 0x283   :  { %2588 = vmatprep.subr.bf16.mxu0 %v3982_v32 }
 0x286   :  { %2589 = vmatpush1.bf16.msra.mxu0 %v3980_v33 }
 0x287   :  { %2590 = vmatprep.subr.bf16.mxu0 %v3985_v34 }
 0x28a   :  { %2591 = vmatpush1.bf16.msra.mxu0 %v3983_v35 }
 0x28b   :  { %2592 = vmatprep.subr.bf16.mxu0 %v3988_v36 }
 0x28e   :  { %2593 = vmatpush1.bf16.msra.mxu0 %v3986_v38  ;;  %v3392_v38 = vld [vmem:[%s4620_s12] ss:$0 sm:$0xff] }
 0x28f   :  { %2594 = vmatprep.subr.bf16.mxu0 %v3991_v39  ;;  %v3404_v39 = vld [vmem:[#allocation3] sm:$0xff]  }
 0x292   :  { %2595 = vmatpush1.bf16.msra.mxu0 %v3989_v40 }
 0x293   :  { %2596 = vmatprep.subr.bf16.mxu0 %v3994_v41  ;;  %v3408_v41 = vld [vmem:[#allocation6] sm:$0xff]  }
 0x296   :  { %2597 = vmatpush1.bf16.msra.mxu0 %v3992_v42 }
 0x297   :  { %2598 = vmatprep.subr.bf16.mxu0 %v3997_v43 }
 0x29a   :  { %2599 = vmatpush1.bf16.msra.mxu0 %v3995_v44 }
 0x29b   :  { %2600 = vmatprep.subr.bf16.mxu0 %v4000_v45  ;;  %v3405_v45 = vunpack.c.l.bf16 %v3404_v39 }
 0x29e   :  { %2601 = vmatpush1.bf16.msra.mxu0 %v3998_v46 }
 0x29f   :  { %2602 = vmatprep.subr.bf16.mxu0 %v4003_v47 }
 0x2a2   :  { %2603 = vmatpush1.bf16.msra.mxu0 %v4001_v48  ;;  %v3406_v48 = vunpack.c.h.bf16 %v3404_v39 }
 0x2a3   :  { %2604 = vmatprep.subr.bf16.mxu0 %v4006_v49  ;;  %v3409_v49 = vunpack.c.l.bf16 %v3408_v41 }
 0x2a6   :  { %2605 = vmatpush1.bf16.msra.mxu0 %v4004_v50  ;;  %v3410_v50 = vunpack.c.h.bf16 %v3408_v41 }
 0x2a7   :  { %2606 = vmatprep.subr.bf16.mxu0 %v4009_v51 }
 0x2aa   :  { %2607 = vmatpush1.bf16.msra.mxu0 %v4007_v52 }
 0x2ab   :  { %2608 = vmatprep.subr.bf16.mxu0 %v4012_v53 }
 0x2ae   :  { %2609 = vmatpush1.bf16.msra.mxu0 %v4010_v54  ;;  %v171_v54 = vmul.f32 %v3409_v49, %v3405_v45 }
 0x2af   :  { %2610 = vmatprep.subr.bf16.mxu0 %v4015_v55  ;;  %v172_v55 = vmul.f32 %v3410_v50, %v3406_v48 }
 0x2b2   :  { %2611 = vmatpush1.bf16.msra.mxu0 %v4013_v56 }
 0x2b3   :  { %2612 = vmatprep.subr.bf16.mxu0 %v4018_v59  ;;  %v2927_v59 = vld [vmem:[%s4622_s14] sm:$0x1] }
 0x2b4   :  { %v2928_v61 = vpack.c.bf16 %v2927_v59, %v2927_v59 }
 0x2b6   :  { %2613 = vmatpush1.bf16.msra.mxu0 %v4016_v60  ;;  %v2926_v60 = vpack.c.bf16 %v172_v55, %v171_v54 }
 0x2b8   :  { %v2981_v62 = vsel %vm2930_vm1, %v2926_v60, 0 }
 0x2b9   :  { %2615 = vmatmul.mubr.bf16.vlgmr.msra.gmra.mrb[4].mxu0 %v4515_v24  ;;  %v4042_v24 = vld [vmem:[%s4619_s11 + $0x38] sm:$0xff]  }
 0x38c   :  { %v2616_v6 = vpop.f32.mrb[4].mxu0 }
 0x38d   :  { %v3478_v7 = vadd.f32 %v2616_v6, %v2212_v4  ;;  %v2618_v8 = vpop.f32.mrb[5].mxu0 }
 0x38e   :  { %v3479_v9 = vadd.f32 %v2618_v8, %v2216_v5  ;;  %v2620_v10 = vpop.f32.mrb[6].mxu0 }
 0x38f   :  { %v3480_v11 = vadd.f32 %v2620_v10, %v2212_v4  ;;  %v2622_v12 = vpop.f32.mrb[7].mxu0  ;;  %v2625_v14 = vmax.f32 %v3478_v7, 0.0  ;;  %v3024_v7 = vstv %s4623_s15 }
 0x390   :  { %v3481_v13 = vadd.f32 %v2622_v12, %v2216_v5  ;;  %v2626_v16 = vmax.f32 %v3479_v9, 0.0 }
 0x391   :  { %v2627_v15 = vmax.f32 %v3480_v11, 0.0 }
 0x392   :  { %v2628_v17 = vmax.f32 %v3481_v13, 0.0 }
 0x393   :  { %v2629_v18 = vpack.c.bf16 %v2627_v15, %v2625_v14 }
 0x394   :  { %v2630_v19 = vpack.c.bf16 %v2628_v17, %v2626_v16 }
 0x396   :  { %2798 = vmatprep.mubr.bf16.mxu1 %v2630_v19 }
 0x397   :  { %2799 = vmatmul.mubr.bf16.vlgmr.msra.gmra.mrb[4].mxu1 %v2629_v18 }
 0x398   :  { %3447 = vmatpush3.bf16.msra.mxu1 %v4035_v57  ;;  %3462 = vmatprep.mubr.msk.bf16.mxu1 %vm4268_vm0, %v4267_v2 }
 0x399   :  { %3448 = vmatprep.subr.bf16.mxu1 %v4267_v2 }
 0x39c   :  { %3449 = vmatpush3.bf16.msra.mxu1 %v4036_v37 }
 0x39d   :  { %3450 = vmatprep.subr.bf16.mxu1 %v4267_v2 }
 0x3a0   :  { %3451 = vmatpush3.bf16.msra.mxu1 %v4037_v58 }
 0x3a1   :  { %3452 = vmatprep.subr.bf16.mxu1 %v4267_v2 }
 0x3a4   :  { %3453 = vmatpush3.bf16.msra.mxu1 %v4038_v20 }
 0x3a5   :  { %3454 = vmatprep.subr.bf16.mxu1 %v4267_v2 }
 0x3a8   :  { %3455 = vmatpush3.bf16.msra.mxu1 %v4039_v21 }
 0x3a9   :  { %3456 = vmatprep.subr.bf16.mxu1 %v4267_v2 }
 0x3ac   :  { %3457 = vmatpush3.bf16.msra.mxu1 %v4040_v22 }
 0x3ad   :  { %3458 = vmatprep.subr.bf16.mxu1 %v4267_v2 }
 0x3b0   :  { %3459 = vmatpush3.bf16.msra.mxu1 %v4041_v23 }
 0x3b1   :  { %3460 = vmatprep.subr.bf16.mxu1 %v4267_v2 }
 0x3b4   :  { %3461 = vmatpush3.bf16.msra.mxu1 %v4042_v24 }
 0x3b5   :  { %3466 = vmatprep.subr.bf16.mxu1 %v4267_v2 }
 0x46a   :  { %v3427_v25 = vpop.f32.mrb[4].mxu1 }
 0x46b   :  { %v3428_v27 = vpop.f32.mrb[5].mxu1 }
 0x46c   :  { %v3429_v28 = vadd.f32 %v3428_v27, %v3427_v25  ;;  %v3430_v29 = vpop.f32.mrb[6].mxu1 }
 0x46d   :  { %v3431_v30 = vpop.f32.mrb[7].mxu1 }
 0x46e   :  { %v2801_v31 = vadd.f32 %v3429_v28, %v3375_v26  ;;  %v3432_v32 = vadd.f32 %v3431_v30, %v3430_v29 }
 0x470   :  { %v2804_v33 = vadd.f32 %v3432_v32, %v3375_v26  ;;  %v2807_v34 = vmax.f32 %v2801_v31, 0.0 }
 0x472   :  { %v2808_v35 = vmax.f32 %v2804_v33, 0.0 }
 0x474   :  { %v2809_v36 = vpack.c.bf16 %v2808_v35, %v2807_v34 }
 0x476   :  { %3463 = vmatmul.mubr.bf16.vlgmr.msra.gmra.mrb[8].mxu1 %v2809_v36 }
 0x477   :  { %3468 = vmatprep.mubr.msk.bf16.mxu1 %vm4268_vm0, %v4267_v2 }
 0x549   :  { %v2915_v40 = vpop.f32.mrb[8].mxu1 }
 0x54a   :  { %v2916_v42 = vadd.f32 %v3392_v38, %v2915_v40  ;;  %v3464_v43 = vpop.f32.mrb[9].mxu1 }
 0x54b   :  { %v2918_v44 = vpop.f32.mrb[10].mxu1 }
 0x54c   :  { %v2919_v46 = vadd.f32 %v3392_v38, %v2918_v44  ;;  %v3465_v47 = vpop.f32.mrb[11].mxu1  ;;  %v2922_v51 = vmax.f32 %v2916_v42, 0.0 }
 0x54e   :  { %v2923_v52 = vmax.f32 %v2919_v46, 0.0 }
 0x550   :  { %v2929_v53 = vpack.c.bf16 %v2923_v52, %v2922_v51 }
 0x552   :  { %v2935_v56 = vsel %vm2930_vm1, %v2929_v53, 0 }
 0x553   :  { %3467 = vmatpush3.bf16.xpose.msra.mxu1 %v2935_v56 }
 0x554   :  { %3472 = vmatprep.subr.bf16.mxu1 %v4267_v2 }
 0x55a   :  { %3469 = vmatmul.mubr.msk.bf16.vlgmr.msra.gmra.mrb[12].mxu1 %vm2930_vm1, %v2928_v61 }
 0x55b   :  { %3473 = vmatpush3.bf16.xpose.msra.mxu1 %v2981_v62  ;;  %3474 = vmatprep.mubr.msk.bf16.mxu1 %vm4268_vm0, %v4267_v2 }
 0x562   :  { %3475 = vmatmul.mubr.msk.bf16.vlgmr.msra.gmra.mrb[16].mxu1 %vm2930_vm1, %v2925_v0 }
 0x62d   :  { %v2971_v1 = vpop.f32.mrb[12].mxu1 }
 0x62e   :  { %v3470_v3 = vpop.f32.mrb[13].mxu1 }
 0x62f   :  { %v2974_v4 = vpop.f32.mrb[14].mxu1 }
 0x630   :  { %v3471_v5 = vpop.f32.mrb[15].mxu1 }
 0x635   :  { %v3017_v6 = vpop.f32.mrb[16].mxu1 }
 0x636   :  { %v3018_v8 = vadd.f32 %v3017_v6, %v2971_v1  ;;  %v3476_v2 = vpop.f32.mrb[17].mxu1 }
 0x637   :  { %v3020_v9 = vpop.f32.mrb[18].mxu1 }
 0x638   :  { %v3025_v10 = vadd.f32 %v3024_v7, %v3018_v8  ;;  %v3477_v11 = vpop.f32.mrb[19].mxu1 }
 0x63a   :  { %3027 = vst.msk [vmem:[#allocation17] sm:$0x1] %vm3026_vm2, %v3025_v10 }
 0x63b   :  { %4230 = shalt.err (!%p4227_p12)
}
 0x63c   :  { %s4632_s18 = sld [smem:[#allocation25_spill]] }
 0x642   :  { %s4231_s30 = scalar_lea.hbm %s4632_s18, 16 }
 0x643   :  { %p4232_p13 = scmp.ne.s32.totalorder %s4632_s18, %s4231_s30  ;;  %p4235_p0 = scmp.lt.u32.totalorder %s4231_s30, %s4632_s18 }
 0x645   :  { %p4237_p1 = pnand %p4235_p0, %p4232_p13 }
 0x647   :  { %4240 = shalt.err (!%p4237_p1)
}
 0x648   :  { %3037 = dma.vmem_to_hbm [thread:$0]  %s3035_s4, 16, %s4632_s18, [#allocation5]  }
 0x649   :  { %4251 = dma.done.wait [#allocation5], 16  }
 0x64a   :  { %4252 = vsyncadd [#allocation5], 4294967280 }
 0x64b   :  { %3041 = vsyncpa [#allocation4], 1 }
 0x64c   :  { %3042 = vsyncpa [#allocation7], 1 }
 0x64d   :  { %3043 = vsyncpa [#allocation10], 1 }
 0x64e   :  { %3044 = vsyncpa [#allocation13], 1 }
 0x64f   :  { %3045 = vsyncpa [#allocation16], 1 }
 0x650   :  { %3046 = vsyncpa [#allocation5], 1 }

</bundles_post_ra>
